<compile_context>
chip_gen: v7x
topology: tpu7x:2x2x1
jax: 0.10.0
libtpu: 0.0.40
codegen_flags: <defaults>
</compile_context>

<pallas_src>
import jax
import jax.numpy as jnp
from jax import lax
from jax.experimental import pallas as pl
from jax.experimental.pallas import tpu as pltpu

LANE = 128      # lane tile (last dim)
SUBLANE = 8     # sublane tile (second-to-last dim)


def _round_up(x, m):
    return ((x + m - 1) // m) * m


def _pick_time_block(S, Bp, Hp, gi_itemsize, max_block=64, budget_bytes=8 << 20):
    """Time steps per grid iteration, sized so the double-buffered gi + out
    blocks stay within `budget_bytes`.  No divisor constraint (time is padded
    to a multiple of T_rec in the wrapper); never falls back to T_rec=S blow-ups."""
    per_step = 2 * Bp * (3 * Hp * gi_itemsize + Hp * 4)   # gi blk + f32 out blk, x2 buffers
    t = budget_bytes // max(per_step, 1)
    return int(max(1, min(S, max_block, t)))


def _vmem_limit(T_rec, Bp, Hp, gi_itemsize, w_itemsize):
    """Shape-derived VMEM limit: 2x streamed blocks + resident weights + scratch,
    with 2x headroom, floored at 16 MiB and capped at 48 MiB (v7x-safe)."""
    G3 = 3 * Hp
    gi_blk = T_rec * Bp * G3 * gi_itemsize
    out_blk = T_rec * Bp * Hp * 4
    weights = Hp * G3 * w_itemsize + Hp * 4
    scratch = Bp * Hp * 4
    need = 2 * (gi_blk + out_blk) + 2 * weights + scratch
    return int(min(max(2 * need, 16 << 20), 48 << 20))


def init_params(key, input_size, hidden_size):
    """PyTorch-style uniform(-1/sqrt(fan_in)) init; weights stored pre-transposed
    so the kernel computes x @ W.  Gate order along the 3H axis: [r | z | n]."""
    ks = jax.random.split(key, 6)
    lin_b = 1.0 / jnp.sqrt(jnp.float32(input_size))
    gru_b = 1.0 / jnp.sqrt(jnp.float32(hidden_size))
    u = lambda k, shape, b: jax.random.uniform(k, shape, jnp.float32, -b, b)
    return {
        "wc":   u(ks[0], (input_size, hidden_size), lin_b),
        "bc":   u(ks[1], (1, hidden_size), lin_b),
        "w_ih": u(ks[2], (hidden_size, 3 * hidden_size), gru_b),
        "w_hh": u(ks[3], (hidden_size, 3 * hidden_size), gru_b),
        "b_ih": u(ks[4], (1, 3 * hidden_size), gru_b),
        "b_hh": u(ks[5], (1, 3 * hidden_size), gru_b),
    }


def prepare_params(params, compute_dtype=jnp.float32):
    """Fold the compress Linear into the GRU input projection, fold the r/z
    thirds of b_hh into the input-side bias, zero-pad H to a multiple of 128
    lanes per gate, and cast matmul weights to compute_dtype."""
    wc, bc = params["wc"], params["bc"]
    w_ih, w_hh = params["w_ih"], params["w_hh"]
    b_ih, b_hh = params["b_ih"], params["b_hh"]
    H = wc.shape[1]
    Hp = _round_up(H, LANE)

    def pad_gate_cols(w):                       # (R, 3H) -> (R, 3Hp), zero fill
        r = w.reshape(w.shape[0], 3, H)
        r = jnp.pad(r, ((0, 0), (0, 0), (0, Hp - H)))
        return r.reshape(w.shape[0], 3 * Hp)

    wc_p = jnp.pad(wc, ((0, 0), (0, Hp - H)))                     # (F, Hp)
    bc_p = jnp.pad(bc, ((0, 0), (0, Hp - H)))                     # (1, Hp)
    wih_p = pad_gate_cols(jnp.pad(w_ih, ((0, Hp - H), (0, 0))))   # (Hp, 3Hp)
    whh_p = pad_gate_cols(jnp.pad(w_hh, ((0, Hp - H), (0, 0))))   # (Hp, 3Hp)
    bih_p = pad_gate_cols(b_ih)                                   # (1, 3Hp)
    bhh_p = pad_gate_cols(b_hh)                                   # (1, 3Hp)

    # Affine fold (f32 dots): (x@Wc + bc)@W_ih + b_ih == x@(Wc@W_ih) + (bc@W_ih + b_ih)
    wf = jnp.dot(wc_p, wih_p, preferred_element_type=jnp.float32)   # (F, 3Hp)
    bf = jnp.dot(bc_p, wih_p, preferred_element_type=jnp.float32) + bih_p
    # Fold r/z hidden biases (outside gating in PyTorch); keep b_hn separate
    # (it sits inside r*(h@W_hn + b_hn)).
    bf = bf.at[:, :2 * Hp].add(bhh_p[:, :2 * Hp])
    b_hn = bhh_p[:, 2 * Hp:]                                         # (1, Hp)

    return {
        "wf":   wf.astype(compute_dtype),
        "bf":   bf.astype(jnp.float32),
        "w_hh": whh_p.astype(compute_dtype),
        "b_hn": b_hn.astype(jnp.float32),
        "Hp":   Hp,
    }


def _gru_kernel(gi_ref, whh_ref, bhn_ref, out_ref, h_ref):
    """One grid step = T_rec GRU time steps (fori_loop, unroll=True).

    gi_ref  : (T, Bp, 3Hp)       precomputed input-side gate pre-activations
    whh_ref : (Hp, 3Hp)          recurrent weights, gate order r|z|n
    bhn_ref : (1, Hp)  f32       n-gate hidden bias (inside r*(...))
    out_ref : (T, Bp, Hp) f32    per-step hidden outputs (time-major)
    h_ref   : VMEM (Bp, Hp) f32  recurrent-state carry across grid steps
    """
    @pl.when(pl.program_id(0) == 0)
    def _():
        h_ref[...] = jnp.zeros_like(h_ref)

    T, Bp, _ = gi_ref.shape
    Hp = h_ref.shape[-1]

    w_hh = whh_ref[...]                                     # hoisted resident weight load
    b_hn = jnp.broadcast_to(bhn_ref[...], (Bp, Hp))         # hoisted broadcast

    def step(t, h):
        gi = gi_ref[t].astype(jnp.float32)                  # (Bp, 3Hp)
        gh = jnp.dot(h.astype(w_hh.dtype), w_hh,
                     preferred_element_type=jnp.float32)    # (Bp, 3Hp)
        rz = jax.nn.sigmoid(gi[:, :2 * Hp] + gh[:, :2 * Hp])   # one EUP slab
        r = rz[:, :Hp]
        z = rz[:, Hp:]
        n = jnp.tanh(gi[:, 2 * Hp:] + r * (gh[:, 2 * Hp:] + b_hn))
        h = n + z * (h - n)
        out_ref[t] = h                                      # lane-dense store
        return h

    h_ref[...] = lax.fori_loop(0, T, step, h_ref[...], unroll=True)


def encoder_rnn_forward(x, params, *, compute_dtype=jnp.float32):
    """x: (B, S, F) float32, batch_first (same as the PyTorch module).
    Returns (output (B, S, H) f32, hidden_state (1, B, H) f32)."""
    B, S, F = x.shape
    H = params["wc"].shape[1]
    prep = prepare_params(params, compute_dtype)
    Hp = prep["Hp"]
    G3 = 3 * Hp

    Bp = _round_up(max(B, 1), SUBLANE)

    # Layout copy on the SMALL array: time-major x, then one big input matmul
    # that already produces gi in the (S, Bp, 3Hp) layout the kernel reads.
    x_tm = jnp.transpose(x, (1, 0, 2))                               # (S, B, F)
    if Bp != B:
        x_tm = jnp.pad(x_tm, ((0, 0), (0, Bp - B), (0, 0)))
    gi = (jnp.dot(x_tm.reshape(S * Bp, F).astype(compute_dtype), prep["wf"],
                  preferred_element_type=jnp.float32)
          + prep["bf"]).reshape(S, Bp, G3)
    gi = gi.astype(compute_dtype)          # bf16 storage halves gi DMA when enabled

    gi_isize = jnp.dtype(gi.dtype).itemsize
    w_isize = jnp.dtype(compute_dtype).itemsize
    T_rec = _pick_time_block(S, Bp, Hp, gi_isize)
    Sp = _round_up(S, T_rec)
    if Sp != S:                            # pad time; padded steps come after the
        gi = jnp.pad(gi, ((0, Sp - S), (0, 0), (0, 0)))   # real ones -> sliced off

    out_tm = pl.pallas_call(
        _gru_kernel,
        out_shape=jax.ShapeDtypeStruct((Sp, Bp, Hp), jnp.float32),
        grid_spec=pltpu.PrefetchScalarGridSpec(
            num_scalar_prefetch=0,
            grid=(Sp // T_rec,),
            in_specs=[
                pl.BlockSpec((T_rec, Bp, G3), lambda s: (s, 0, 0)),   # gi block
                pl.BlockSpec((Hp, G3), lambda s: (0, 0)),             # w_hh (resident)
                pl.BlockSpec((1, Hp), lambda s: (0, 0)),              # b_hn (resident)
            ],
            out_specs=pl.BlockSpec((T_rec, Bp, Hp), lambda s: (s, 0, 0)),
            scratch_shapes=[pltpu.VMEM((Bp, Hp), jnp.float32)],
        ),
        compiler_params=pltpu.CompilerParams(
            dimension_semantics=("arbitrary",),          # true recurrence: in order
            vmem_limit_bytes=_vmem_limit(T_rec, Bp, Hp, gi_isize, w_isize)),
    )(gi, prep["w_hh"], prep["b_hn"])

    # Slice padding off FIRST (time, batch, lanes), then one layout op back to
    # the module's batch_first contract.
    output = jnp.transpose(out_tm[:S, :B, :H], (1, 0, 2))            # (B, S, H)
    # Single-layer unidirectional GRU: h_n == last per-step output.
    hidden_state = output[:, -1, :][None]                            # (1, B, H)
    return output, hidden_state


# ---------------------------------------------------------------------------
# reference for verification: un-fused, full-f32 eval-mode forward
# ---------------------------------------------------------------------------
def _reference_f32(x, params):
    B, S, F = x.shape
    H = params["wc"].shape[1]
    xc = (x.reshape(-1, F) @ params["wc"] + params["bc"]).reshape(B, S, H)

    def step(h, x_t):
        gi = x_t @ params["w_ih"] + params["b_ih"]
        gh = h @ params["w_hh"] + params["b_hh"]
        r = jax.nn.sigmoid(gi[:, :H] + gh[:, :H])
        z = jax.nn.sigmoid(gi[:, H:2 * H] + gh[:, H:2 * H])
        n = jnp.tanh(gi[:, 2 * H:] + r * gh[:, 2 * H:])
        h_new = (1.0 - z) * n + z * h
        return h_new, h_new

    h0 = jnp.zeros((B, H), jnp.float32)
    hN, outs = jax.lax.scan(step, h0, jnp.transpose(xc, (1, 0, 2)))
    return jnp.transpose(outs, (1, 0, 2)), hN[None]


if __name__ == "__main__":
    # small shapes consistent with the module's forward: (batch, seq, feat)
    B, S, F, H = 2, 8, 16, 32
    key = jax.random.PRNGKey(0)
    k_x, k_p, k_x2 = jax.random.split(key, 3)
    x = jax.random.normal(k_x, (B, S, F), dtype=jnp.float32)
    params = init_params(k_p, F, H)

    fwd = jax.jit(encoder_rnn_forward)
    output, hidden_state = fwd(x, params)
    output = jax.block_until_ready(output)
    hidden_state = jax.block_until_ready(hidden_state)

    assert output.shape == (B, S, H)
    assert hidden_state.shape == (1, B, H)
    assert bool(jnp.all(jnp.isfinite(output)))

    # semantics check vs. the original un-fused full-f32 forward
    # (tolerance covers TPU default-precision f32 matmuls + the affine fold)
    ref_out, ref_h = _reference_f32(x, params)
    assert jnp.allclose(output, ref_out, atol=5e-3, rtol=5e-3), \
        float(jnp.max(jnp.abs(output - ref_out)))
    assert jnp.allclose(hidden_state, ref_h, atol=5e-3, rtol=5e-3)

    # robustness: odd seq length (no nice divisor) and odd batch exercise the
    # time/batch padding paths.
    B2, S2 = 3, 13
    x2 = jax.random.normal(k_x2, (B2, S2, F), dtype=jnp.float32)
    out2, h2 = jax.jit(encoder_rnn_forward)(x2, params)
    out2 = jax.block_until_ready(out2)
    h2 = jax.block_until_ready(h2)
    ref_out2, ref_h2 = _reference_f32(x2, params)
    assert out2.shape == (B2, S2, H) and h2.shape == (1, B2, H)
    assert jnp.allclose(out2, ref_out2, atol=5e-3, rtol=5e-3), \
        float(jnp.max(jnp.abs(out2 - ref_out2)))
    assert jnp.allclose(h2, ref_h2, atol=5e-3, rtol=5e-3)

    print("KERNEL_OK")
</pallas_src>

<mosaic_0001>
module attributes {stable_mosaic.version = 11 : i64} {
  func.func @_gru_kernel(%arg0: i32, %arg1: memref<8x8x384xf32, #tpu.memory_space<vmem>>, %arg2: memref<128x384xf32, #tpu.memory_space<vmem>>, %arg3: memref<1x128xf32, #tpu.memory_space<vmem>>, %arg4: memref<8x8x128xf32, #tpu.memory_space<vmem>>, %arg5: memref<8x128xf32, #tpu.memory_space<vmem>>) attributes {dimension_semantics = [#tpu.dimension_semantics<arbitrary>], iteration_bounds = array<i64: 1>, scalar_prefetch = 0 : i64, scratch_operands = 1 : i64, tpu.core_type = #tpu.core_type<tc>, window_params = [{transform_indices = @transform_0, window_bounds = array<i64: 8, 8, 384>}, {pipeline_mode = #tpu.pipeline_mode<synchronous>, transform_indices = @transform_1, window_bounds = array<i64: 128, 384>}, {pipeline_mode = #tpu.pipeline_mode<synchronous>, transform_indices = @transform_2, window_bounds = array<i64: 1, 128>}, {transform_indices = @transform_3, window_bounds = array<i64: 8, 8, 128>}]} {
    %c0_i32 = arith.constant 0 : i32
    %0 = arith.cmpi eq, %arg0, %c0_i32 : i32
    %1 = arith.extui %0 : i1 to i32
    %c0_i32_0 = arith.constant 0 : i32
    %2 = arith.cmpi ne, %1, %c0_i32_0 : i32
    scf.if %2 {
      %cst_56 = arith.constant 0.000000e+00 : f32
      %225 = vector.broadcast %cst_56 : f32 to vector<8x128xf32>
      %c0_57 = arith.constant 0 : index
      %c0_58 = arith.constant 0 : index
      %226 = vector.load %arg5[%c0_57, %c0_58] : memref<8x128xf32, #tpu.memory_space<vmem>>, vector<8x128xf32>
      tpu.vector_store %arg5[%c0_57, %c0_58], %225 {strides = array<i32>} : memref<8x128xf32, #tpu.memory_space<vmem>>, vector<8x128xf32>,
    } else {
    }
    %c0 = arith.constant 0 : index
    %c0_1 = arith.constant 0 : index
    %3 = vector.load %arg2[%c0, %c0_1] : memref<128x384xf32, #tpu.memory_space<vmem>>, vector<128x384xf32>
    %c0_2 = arith.constant 0 : index
    %c0_3 = arith.constant 0 : index
    %4 = vector.load %arg3[%c0_2, %c0_3] : memref<1x128xf32, #tpu.memory_space<vmem>>, vector<1x128xf32>
    %5 = vector.shape_cast %4 : vector<1x128xf32> to vector<1x128xf32>
    %6 = vector.broadcast %5 : vector<1x128xf32> to vector<8x128xf32>
    %c0_4 = arith.constant 0 : index
    %c0_5 = arith.constant 0 : index
    %7 = vector.load %arg5[%c0_4, %c0_5] : memref<8x128xf32, #tpu.memory_space<vmem>>, vector<8x128xf32>
    %c0_i32_6 = arith.constant 0 : i32
    %8 = arith.index_cast %c0_i32_6 : i32 to index
    %c0_7 = arith.constant 0 : index
    %c0_8 = arith.constant 0 : index
    %9 = vector.load %arg1[%8, %c0_7, %c0_8] : memref<8x8x384xf32, #tpu.memory_space<vmem>>, vector<1x8x384xf32>
    %10 = vector.shape_cast %9 : vector<1x8x384xf32> to vector<8x384xf32>
    %cst = arith.constant dense<0.000000e+00> : vector<8x384xf32>
    %11 = tpu.matmul %7, %3, %cst {dimension_numbers = #tpu.dot_dimension_numbers<[1], [0], [0], [1], [0, 0, 1, 1], [], []>} : vector<8x128xf32>, vector<128x384xf32>, vector<8x384xf32> -> vector<8x384xf32>
    %12 = vector.extract_strided_slice %10 {offsets = [0, 0], sizes = [8, 256], strides = [1, 1]} : vector<8x384xf32> to vector<8x256xf32>
    %13 = vector.extract_strided_slice %11 {offsets = [0, 0], sizes = [8, 256], strides = [1, 1]} : vector<8x384xf32> to vector<8x256xf32>
    %14 = arith.addf %12, %13 : vector<8x256xf32>
    %15 = arith.negf %14 : vector<8x256xf32>
    %16 = math.exp %15 : vector<8x256xf32>
    %cst_9 = arith.constant 1.000000e+00 : f32
    %17 = vector.broadcast %cst_9 : f32 to vector<8x256xf32>
    %18 = arith.addf %17, %16 : vector<8x256xf32>
    %19 = arith.divf %17, %18 : vector<8x256xf32>
    %20 = vector.extract_strided_slice %19 {offsets = [0, 0], sizes = [8, 128], strides = [1, 1]} : vector<8x256xf32> to vector<8x128xf32>
    %21 = vector.extract_strided_slice %19 {offsets = [0, 128], sizes = [8, 128], strides = [1, 1]} : vector<8x256xf32> to vector<8x128xf32>
    %22 = vector.extract_strided_slice %10 {offsets = [0, 256], sizes = [8, 128], strides = [1, 1]} : vector<8x384xf32> to vector<8x128xf32>
    %23 = vector.extract_strided_slice %11 {offsets = [0, 256], sizes = [8, 128], strides = [1, 1]} : vector<8x384xf32> to vector<8x128xf32>
    %24 = arith.addf %23, %6 : vector<8x128xf32>
    %25 = arith.mulf %20, %24 : vector<8x128xf32>
    %26 = arith.addf %22, %25 : vector<8x128xf32>
    %27 = math.tanh %26 : vector<8x128xf32>
    %28 = arith.subf %7, %27 : vector<8x128xf32>
    %29 = arith.mulf %21, %28 : vector<8x128xf32>
    %30 = arith.addf %27, %29 : vector<8x128xf32>
    %31 = arith.index_cast %c0_i32_6 : i32 to index
    %c0_10 = arith.constant 0 : index
    %c0_11 = arith.constant 0 : index
    %32 = vector.load %arg4[%31, %c0_10, %c0_11] : memref<8x8x128xf32, #tpu.memory_space<vmem>>, vector<1x8x128xf32>
    %33 = vector.shape_cast %32 : vector<1x8x128xf32> to vector<8x128xf32>
    %34 = vector.shape_cast %30 : vector<8x128xf32> to vector<1x8x128xf32>
    tpu.vector_store %arg4[%31, %c0_10, %c0_11], %34 {strides = array<i32>} : memref<8x8x128xf32, #tpu.memory_space<vmem>>, vector<1x8x128xf32>,
    %c1_i32 = arith.constant 1 : i32
    %35 = arith.index_cast %c1_i32 : i32 to index
    %c0_12 = arith.constant 0 : index
    %c0_13 = arith.constant 0 : index
    %36 = vector.load %arg1[%35, %c0_12, %c0_13] : memref<8x8x384xf32, #tpu.memory_space<vmem>>, vector<1x8x384xf32>
    %37 = vector.shape_cast %36 : vector<1x8x384xf32> to vector<8x384xf32>
    %cst_14 = arith.constant dense<0.000000e+00> : vector<8x384xf32>
    %38 = tpu.matmul %30, %3, %cst_14 {dimension_numbers = #tpu.dot_dimension_numbers<[1], [0], [0], [1], [0, 0, 1, 1], [], []>} : vector<8x128xf32>, vector<128x384xf32>, vector<8x384xf32> -> vector<8x384xf32>
    %39 = vector.extract_strided_slice %37 {offsets = [0, 0], sizes = [8, 256], strides = [1, 1]} : vector<8x384xf32> to vector<8x256xf32>
    %40 = vector.extract_strided_slice %38 {offsets = [0, 0], sizes = [8, 256], strides = [1, 1]} : vector<8x384xf32> to vector<8x256xf32>
    %41 = arith.addf %39, %40 : vector<8x256xf32>
    %42 = arith.negf %41 : vector<8x256xf32>
    %43 = math.exp %42 : vector<8x256xf32>
    %cst_15 = arith.constant 1.000000e+00 : f32
    %44 = vector.broadcast %cst_15 : f32 to vector<8x256xf32>
    %45 = arith.addf %44, %43 : vector<8x256xf32>
    %46 = arith.divf %44, %45 : vector<8x256xf32>
    %47 = vector.extract_strided_slice %46 {offsets = [0, 0], sizes = [8, 128], strides = [1, 1]} : vector<8x256xf32> to vector<8x128xf32>
    %48 = vector.extract_strided_slice %46 {offsets = [0, 128], sizes = [8, 128], strides = [1, 1]} : vector<8x256xf32> to vector<8x128xf32>
    %49 = vector.extract_strided_slice %37 {offsets = [0, 256], sizes = [8, 128], strides = [1, 1]} : vector<8x384xf32> to vector<8x128xf32>
    %50 = vector.extract_strided_slice %38 {offsets = [0, 256], sizes = [8, 128], strides = [1, 1]} : vector<8x384xf32> to vector<8x128xf32>
    %51 = arith.addf %50, %6 : vector<8x128xf32>
    %52 = arith.mulf %47, %51 : vector<8x128xf32>
    %53 = arith.addf %49, %52 : vector<8x128xf32>
    %54 = math.tanh %53 : vector<8x128xf32>
    %55 = arith.subf %30, %54 : vector<8x128xf32>
    %56 = arith.mulf %48, %55 : vector<8x128xf32>
    %57 = arith.addf %54, %56 : vector<8x128xf32>
    %58 = arith.index_cast %c1_i32 : i32 to index
    %c0_16 = arith.constant 0 : index
    %c0_17 = arith.constant 0 : index
    %59 = vector.load %arg4[%58, %c0_16, %c0_17] : memref<8x8x128xf32, #tpu.memory_space<vmem>>, vector<1x8x128xf32>
    %60 = vector.shape_cast %59 : vector<1x8x128xf32> to vector<8x128xf32>
    %61 = vector.shape_cast %57 : vector<8x128xf32> to vector<1x8x128xf32>
    tpu.vector_store %arg4[%58, %c0_16, %c0_17], %61 {strides = array<i32>} : memref<8x8x128xf32, #tpu.memory_space<vmem>>, vector<1x8x128xf32>,
    %c2_i32 = arith.constant 2 : i32
    %62 = arith.index_cast %c2_i32 : i32 to index
    %c0_18 = arith.constant 0 : index
    %c0_19 = arith.constant 0 : index
    %63 = vector.load %arg1[%62, %c0_18, %c0_19] : memref<8x8x384xf32, #tpu.memory_space<vmem>>, vector<1x8x384xf32>
    %64 = vector.shape_cast %63 : vector<1x8x384xf32> to vector<8x384xf32>
    %cst_20 = arith.constant dense<0.000000e+00> : vector<8x384xf32>
    %65 = tpu.matmul %57, %3, %cst_20 {dimension_numbers = #tpu.dot_dimension_numbers<[1], [0], [0], [1], [0, 0, 1, 1], [], []>} : vector<8x128xf32>, vector<128x384xf32>, vector<8x384xf32> -> vector<8x384xf32>
    %66 = vector.extract_strided_slice %64 {offsets = [0, 0], sizes = [8, 256], strides = [1, 1]} : vector<8x384xf32> to vector<8x256xf32>
    %67 = vector.extract_strided_slice %65 {offsets = [0, 0], sizes = [8, 256], strides = [1, 1]} : vector<8x384xf32> to vector<8x256xf32>
    %68 = arith.addf %66, %67 : vector<8x256xf32>
    %69 = arith.negf %68 : vector<8x256xf32>
    %70 = math.exp %69 : vector<8x256xf32>
    %cst_21 = arith.constant 1.000000e+00 : f32
    %71 = vector.broadcast %cst_21 : f32 to vector<8x256xf32>
    %72 = arith.addf %71, %70 : vector<8x256xf32>
    %73 = arith.divf %71, %72 : vector<8x256xf32>
    %74 = vector.extract_strided_slice %73 {offsets = [0, 0], sizes = [8, 128], strides = [1, 1]} : vector<8x256xf32> to vector<8x128xf32>
    %75 = vector.extract_strided_slice %73 {offsets = [0, 128], sizes = [8, 128], strides = [1, 1]} : vector<8x256xf32> to vector<8x128xf32>
    %76 = vector.extract_strided_slice %64 {offsets = [0, 256], sizes = [8, 128], strides = [1, 1]} : vector<8x384xf32> to vector<8x128xf32>
    %77 = vector.extract_strided_slice %65 {offsets = [0, 256], sizes = [8, 128], strides = [1, 1]} : vector<8x384xf32> to vector<8x128xf32>
    %78 = arith.addf %77, %6 : vector<8x128xf32>
    %79 = arith.mulf %74, %78 : vector<8x128xf32>
    %80 = arith.addf %76, %79 : vector<8x128xf32>
    %81 = math.tanh %80 : vector<8x128xf32>
    %82 = arith.subf %57, %81 : vector<8x128xf32>
    %83 = arith.mulf %75, %82 : vector<8x128xf32>
    %84 = arith.addf %81, %83 : vector<8x128xf32>
    %85 = arith.index_cast %c2_i32 : i32 to index
    %c0_22 = arith.constant 0 : index
    %c0_23 = arith.constant 0 : index
    %86 = vector.load %arg4[%85, %c0_22, %c0_23] : memref<8x8x128xf32, #tpu.memory_space<vmem>>, vector<1x8x128xf32>
    %87 = vector.shape_cast %86 : vector<1x8x128xf32> to vector<8x128xf32>
    %88 = vector.shape_cast %84 : vector<8x128xf32> to vector<1x8x128xf32>
    tpu.vector_store %arg4[%85, %c0_22, %c0_23], %88 {strides = array<i32>} : memref<8x8x128xf32, #tpu.memory_space<vmem>>, vector<1x8x128xf32>,
    %c3_i32 = arith.constant 3 : i32
    %89 = arith.index_cast %c3_i32 : i32 to index
    %c0_24 = arith.constant 0 : index
    %c0_25 = arith.constant 0 : index
    %90 = vector.load %arg1[%89, %c0_24, %c0_25] : memref<8x8x384xf32, #tpu.memory_space<vmem>>, vector<1x8x384xf32>
    %91 = vector.shape_cast %90 : vector<1x8x384xf32> to vector<8x384xf32>
    %cst_26 = arith.constant dense<0.000000e+00> : vector<8x384xf32>
    %92 = tpu.matmul %84, %3, %cst_26 {dimension_numbers = #tpu.dot_dimension_numbers<[1], [0], [0], [1], [0, 0, 1, 1], [], []>} : vector<8x128xf32>, vector<128x384xf32>, vector<8x384xf32> -> vector<8x384xf32>
    %93 = vector.extract_strided_slice %91 {offsets = [0, 0], sizes = [8, 256], strides = [1, 1]} : vector<8x384xf32> to vector<8x256xf32>
    %94 = vector.extract_strided_slice %92 {offsets = [0, 0], sizes = [8, 256], strides = [1, 1]} : vector<8x384xf32> to vector<8x256xf32>
    %95 = arith.addf %93, %94 : vector<8x256xf32>
    %96 = arith.negf %95 : vector<8x256xf32>
    %97 = math.exp %96 : vector<8x256xf32>
    %cst_27 = arith.constant 1.000000e+00 : f32
    %98 = vector.broadcast %cst_27 : f32 to vector<8x256xf32>
    %99 = arith.addf %98, %97 : vector<8x256xf32>
    %100 = arith.divf %98, %99 : vector<8x256xf32>
    %101 = vector.extract_strided_slice %100 {offsets = [0, 0], sizes = [8, 128], strides = [1, 1]} : vector<8x256xf32> to vector<8x128xf32>
    %102 = vector.extract_strided_slice %100 {offsets = [0, 128], sizes = [8, 128], strides = [1, 1]} : vector<8x256xf32> to vector<8x128xf32>
    %103 = vector.extract_strided_slice %91 {offsets = [0, 256], sizes = [8, 128], strides = [1, 1]} : vector<8x384xf32> to vector<8x128xf32>
    %104 = vector.extract_strided_slice %92 {offsets = [0, 256], sizes = [8, 128], strides = [1, 1]} : vector<8x384xf32> to vector<8x128xf32>
    %105 = arith.addf %104, %6 : vector<8x128xf32>
    %106 = arith.mulf %101, %105 : vector<8x128xf32>
    %107 = arith.addf %103, %106 : vector<8x128xf32>
    %108 = math.tanh %107 : vector<8x128xf32>
    %109 = arith.subf %84, %108 : vector<8x128xf32>
    %110 = arith.mulf %102, %109 : vector<8x128xf32>
    %111 = arith.addf %108, %110 : vector<8x128xf32>
    %112 = arith.index_cast %c3_i32 : i32 to index
    %c0_28 = arith.constant 0 : index
    %c0_29 = arith.constant 0 : index
    %113 = vector.load %arg4[%112, %c0_28, %c0_29] : memref<8x8x128xf32, #tpu.memory_space<vmem>>, vector<1x8x128xf32>
    %114 = vector.shape_cast %113 : vector<1x8x128xf32> to vector<8x128xf32>
    %115 = vector.shape_cast %111 : vector<8x128xf32> to vector<1x8x128xf32>
    tpu.vector_store %arg4[%112, %c0_28, %c0_29], %115 {strides = array<i32>} : memref<8x8x128xf32, #tpu.memory_space<vmem>>, vector<1x8x128xf32>,
    %c4_i32 = arith.constant 4 : i32
    %116 = arith.index_cast %c4_i32 : i32 to index
    %c0_30 = arith.constant 0 : index
    %c0_31 = arith.constant 0 : index
    %117 = vector.load %arg1[%116, %c0_30, %c0_31] : memref<8x8x384xf32, #tpu.memory_space<vmem>>, vector<1x8x384xf32>
    %118 = vector.shape_cast %117 : vector<1x8x384xf32> to vector<8x384xf32>
    %cst_32 = arith.constant dense<0.000000e+00> : vector<8x384xf32>
    %119 = tpu.matmul %111, %3, %cst_32 {dimension_numbers = #tpu.dot_dimension_numbers<[1], [0], [0], [1], [0, 0, 1, 1], [], []>} : vector<8x128xf32>, vector<128x384xf32>, vector<8x384xf32> -> vector<8x384xf32>
    %120 = vector.extract_strided_slice %118 {offsets = [0, 0], sizes = [8, 256], strides = [1, 1]} : vector<8x384xf32> to vector<8x256xf32>
    %121 = vector.extract_strided_slice %119 {offsets = [0, 0], sizes = [8, 256], strides = [1, 1]} : vector<8x384xf32> to vector<8x256xf32>
    %122 = arith.addf %120, %121 : vector<8x256xf32>
    %123 = arith.negf %122 : vector<8x256xf32>
    %124 = math.exp %123 : vector<8x256xf32>
    %cst_33 = arith.constant 1.000000e+00 : f32
    %125 = vector.broadcast %cst_33 : f32 to vector<8x256xf32>
    %126 = arith.addf %125, %124 : vector<8x256xf32>
    %127 = arith.divf %125, %126 : vector<8x256xf32>
    %128 = vector.extract_strided_slice %127 {offsets = [0, 0], sizes = [8, 128], strides = [1, 1]} : vector<8x256xf32> to vector<8x128xf32>
    %129 = vector.extract_strided_slice %127 {offsets = [0, 128], sizes = [8, 128], strides = [1, 1]} : vector<8x256xf32> to vector<8x128xf32>
    %130 = vector.extract_strided_slice %118 {offsets = [0, 256], sizes = [8, 128], strides = [1, 1]} : vector<8x384xf32> to vector<8x128xf32>
    %131 = vector.extract_strided_slice %119 {offsets = [0, 256], sizes = [8, 128], strides = [1, 1]} : vector<8x384xf32> to vector<8x128xf32>
    %132 = arith.addf %131, %6 : vector<8x128xf32>
    %133 = arith.mulf %128, %132 : vector<8x128xf32>
    %134 = arith.addf %130, %133 : vector<8x128xf32>
    %135 = math.tanh %134 : vector<8x128xf32>
    %136 = arith.subf %111, %135 : vector<8x128xf32>
    %137 = arith.mulf %129, %136 : vector<8x128xf32>
    %138 = arith.addf %135, %137 : vector<8x128xf32>
    %139 = arith.index_cast %c4_i32 : i32 to index
    %c0_34 = arith.constant 0 : index
    %c0_35 = arith.constant 0 : index
    %140 = vector.load %arg4[%139, %c0_34, %c0_35] : memref<8x8x128xf32, #tpu.memory_space<vmem>>, vector<1x8x128xf32>
    %141 = vector.shape_cast %140 : vector<1x8x128xf32> to vector<8x128xf32>
    %142 = vector.shape_cast %138 : vector<8x128xf32> to vector<1x8x128xf32>
    tpu.vector_store %arg4[%139, %c0_34, %c0_35], %142 {strides = array<i32>} : memref<8x8x128xf32, #tpu.memory_space<vmem>>, vector<1x8x128xf32>,
    %c5_i32 = arith.constant 5 : i32
    %143 = arith.index_cast %c5_i32 : i32 to index
    %c0_36 = arith.constant 0 : index
    %c0_37 = arith.constant 0 : index
    %144 = vector.load %arg1[%143, %c0_36, %c0_37] : memref<8x8x384xf32, #tpu.memory_space<vmem>>, vector<1x8x384xf32>
    %145 = vector.shape_cast %144 : vector<1x8x384xf32> to vector<8x384xf32>
    %cst_38 = arith.constant dense<0.000000e+00> : vector<8x384xf32>
    %146 = tpu.matmul %138, %3, %cst_38 {dimension_numbers = #tpu.dot_dimension_numbers<[1], [0], [0], [1], [0, 0, 1, 1], [], []>} : vector<8x128xf32>, vector<128x384xf32>, vector<8x384xf32> -> vector<8x384xf32>
    %147 = vector.extract_strided_slice %145 {offsets = [0, 0], sizes = [8, 256], strides = [1, 1]} : vector<8x384xf32> to vector<8x256xf32>
    %148 = vector.extract_strided_slice %146 {offsets = [0, 0], sizes = [8, 256], strides = [1, 1]} : vector<8x384xf32> to vector<8x256xf32>
    %149 = arith.addf %147, %148 : vector<8x256xf32>
    %150 = arith.negf %149 : vector<8x256xf32>
    %151 = math.exp %150 : vector<8x256xf32>
    %cst_39 = arith.constant 1.000000e+00 : f32
    %152 = vector.broadcast %cst_39 : f32 to vector<8x256xf32>
    %153 = arith.addf %152, %151 : vector<8x256xf32>
    %154 = arith.divf %152, %153 : vector<8x256xf32>
    %155 = vector.extract_strided_slice %154 {offsets = [0, 0], sizes = [8, 128], strides = [1, 1]} : vector<8x256xf32> to vector<8x128xf32>
    %156 = vector.extract_strided_slice %154 {offsets = [0, 128], sizes = [8, 128], strides = [1, 1]} : vector<8x256xf32> to vector<8x128xf32>
    %157 = vector.extract_strided_slice %145 {offsets = [0, 256], sizes = [8, 128], strides = [1, 1]} : vector<8x384xf32> to vector<8x128xf32>
    %158 = vector.extract_strided_slice %146 {offsets = [0, 256], sizes = [8, 128], strides = [1, 1]} : vector<8x384xf32> to vector<8x128xf32>
    %159 = arith.addf %158, %6 : vector<8x128xf32>
    %160 = arith.mulf %155, %159 : vector<8x128xf32>
    %161 = arith.addf %157, %160 : vector<8x128xf32>
    %162 = math.tanh %161 : vector<8x128xf32>
    %163 = arith.subf %138, %162 : vector<8x128xf32>
    %164 = arith.mulf %156, %163 : vector<8x128xf32>
    %165 = arith.addf %162, %164 : vector<8x128xf32>
    %166 = arith.index_cast %c5_i32 : i32 to index
    %c0_40 = arith.constant 0 : index
    %c0_41 = arith.constant 0 : index
    %167 = vector.load %arg4[%166, %c0_40, %c0_41] : memref<8x8x128xf32, #tpu.memory_space<vmem>>, vector<1x8x128xf32>
    %168 = vector.shape_cast %167 : vector<1x8x128xf32> to vector<8x128xf32>
    %169 = vector.shape_cast %165 : vector<8x128xf32> to vector<1x8x128xf32>
    tpu.vector_store %arg4[%166, %c0_40, %c0_41], %169 {strides = array<i32>} : memref<8x8x128xf32, #tpu.memory_space<vmem>>, vector<1x8x128xf32>,
    %c6_i32 = arith.constant 6 : i32
    %170 = arith.index_cast %c6_i32 : i32 to index
    %c0_42 = arith.constant 0 : index
    %c0_43 = arith.constant 0 : index
    %171 = vector.load %arg1[%170, %c0_42, %c0_43] : memref<8x8x384xf32, #tpu.memory_space<vmem>>, vector<1x8x384xf32>
    %172 = vector.shape_cast %171 : vector<1x8x384xf32> to vector<8x384xf32>
    %cst_44 = arith.constant dense<0.000000e+00> : vector<8x384xf32>
    %173 = tpu.matmul %165, %3, %cst_44 {dimension_numbers = #tpu.dot_dimension_numbers<[1], [0], [0], [1], [0, 0, 1, 1], [], []>} : vector<8x128xf32>, vector<128x384xf32>, vector<8x384xf32> -> vector<8x384xf32>
    %174 = vector.extract_strided_slice %172 {offsets = [0, 0], sizes = [8, 256], strides = [1, 1]} : vector<8x384xf32> to vector<8x256xf32>
    %175 = vector.extract_strided_slice %173 {offsets = [0, 0], sizes = [8, 256], strides = [1, 1]} : vector<8x384xf32> to vector<8x256xf32>
    %176 = arith.addf %174, %175 : vector<8x256xf32>
    %177 = arith.negf %176 : vector<8x256xf32>
    %178 = math.exp %177 : vector<8x256xf32>
    %cst_45 = arith.constant 1.000000e+00 : f32
    %179 = vector.broadcast %cst_45 : f32 to vector<8x256xf32>
    %180 = arith.addf %179, %178 : vector<8x256xf32>
    %181 = arith.divf %179, %180 : vector<8x256xf32>
    %182 = vector.extract_strided_slice %181 {offsets = [0, 0], sizes = [8, 128], strides = [1, 1]} : vector<8x256xf32> to vector<8x128xf32>
    %183 = vector.extract_strided_slice %181 {offsets = [0, 128], sizes = [8, 128], strides = [1, 1]} : vector<8x256xf32> to vector<8x128xf32>
    %184 = vector.extract_strided_slice %172 {offsets = [0, 256], sizes = [8, 128], strides = [1, 1]} : vector<8x384xf32> to vector<8x128xf32>
    %185 = vector.extract_strided_slice %173 {offsets = [0, 256], sizes = [8, 128], strides = [1, 1]} : vector<8x384xf32> to vector<8x128xf32>
    %186 = arith.addf %185, %6 : vector<8x128xf32>
    %187 = arith.mulf %182, %186 : vector<8x128xf32>
    %188 = arith.addf %184, %187 : vector<8x128xf32>
    %189 = math.tanh %188 : vector<8x128xf32>
    %190 = arith.subf %165, %189 : vector<8x128xf32>
    %191 = arith.mulf %183, %190 : vector<8x128xf32>
    %192 = arith.addf %189, %191 : vector<8x128xf32>
    %193 = arith.index_cast %c6_i32 : i32 to index
    %c0_46 = arith.constant 0 : index
    %c0_47 = arith.constant 0 : index
    %194 = vector.load %arg4[%193, %c0_46, %c0_47] : memref<8x8x128xf32, #tpu.memory_space<vmem>>, vector<1x8x128xf32>
    %195 = vector.shape_cast %194 : vector<1x8x128xf32> to vector<8x128xf32>
    %196 = vector.shape_cast %192 : vector<8x128xf32> to vector<1x8x128xf32>
    tpu.vector_store %arg4[%193, %c0_46, %c0_47], %196 {strides = array<i32>} : memref<8x8x128xf32, #tpu.memory_space<vmem>>, vector<1x8x128xf32>,
    %c7_i32 = arith.constant 7 : i32
    %197 = arith.index_cast %c7_i32 : i32 to index
    %c0_48 = arith.constant 0 : index
    %c0_49 = arith.constant 0 : index
    %198 = vector.load %arg1[%197, %c0_48, %c0_49] : memref<8x8x384xf32, #tpu.memory_space<vmem>>, vector<1x8x384xf32>
    %199 = vector.shape_cast %198 : vector<1x8x384xf32> to vector<8x384xf32>
    %cst_50 = arith.constant dense<0.000000e+00> : vector<8x384xf32>
    %200 = tpu.matmul %192, %3, %cst_50 {dimension_numbers = #tpu.dot_dimension_numbers<[1], [0], [0], [1], [0, 0, 1, 1], [], []>} : vector<8x128xf32>, vector<128x384xf32>, vector<8x384xf32> -> vector<8x384xf32>
    %201 = vector.extract_strided_slice %199 {offsets = [0, 0], sizes = [8, 256], strides = [1, 1]} : vector<8x384xf32> to vector<8x256xf32>
    %202 = vector.extract_strided_slice %200 {offsets = [0, 0], sizes = [8, 256], strides = [1, 1]} : vector<8x384xf32> to vector<8x256xf32>
    %203 = arith.addf %201, %202 : vector<8x256xf32>
    %204 = arith.negf %203 : vector<8x256xf32>
    %205 = math.exp %204 : vector<8x256xf32>
    %cst_51 = arith.constant 1.000000e+00 : f32
    %206 = vector.broadcast %cst_51 : f32 to vector<8x256xf32>
    %207 = arith.addf %206, %205 : vector<8x256xf32>
    %208 = arith.divf %206, %207 : vector<8x256xf32>
    %209 = vector.extract_strided_slice %208 {offsets = [0, 0], sizes = [8, 128], strides = [1, 1]} : vector<8x256xf32> to vector<8x128xf32>
    %210 = vector.extract_strided_slice %208 {offsets = [0, 128], sizes = [8, 128], strides = [1, 1]} : vector<8x256xf32> to vector<8x128xf32>
    %211 = vector.extract_strided_slice %199 {offsets = [0, 256], sizes = [8, 128], strides = [1, 1]} : vector<8x384xf32> to vector<8x128xf32>
    %212 = vector.extract_strided_slice %200 {offsets = [0, 256], sizes = [8, 128], strides = [1, 1]} : vector<8x384xf32> to vector<8x128xf32>
    %213 = arith.addf %212, %6 : vector<8x128xf32>
    %214 = arith.mulf %209, %213 : vector<8x128xf32>
    %215 = arith.addf %211, %214 : vector<8x128xf32>
    %216 = math.tanh %215 : vector<8x128xf32>
    %217 = arith.subf %192, %216 : vector<8x128xf32>
    %218 = arith.mulf %210, %217 : vector<8x128xf32>
    %219 = arith.addf %216, %218 : vector<8x128xf32>
    %220 = arith.index_cast %c7_i32 : i32 to index
    %c0_52 = arith.constant 0 : index
    %c0_53 = arith.constant 0 : index
    %221 = vector.load %arg4[%220, %c0_52, %c0_53] : memref<8x8x128xf32, #tpu.memory_space<vmem>>, vector<1x8x128xf32>
    %222 = vector.shape_cast %221 : vector<1x8x128xf32> to vector<8x128xf32>
    %223 = vector.shape_cast %219 : vector<8x128xf32> to vector<1x8x128xf32>
    tpu.vector_store %arg4[%220, %c0_52, %c0_53], %223 {strides = array<i32>} : memref<8x8x128xf32, #tpu.memory_space<vmem>>, vector<1x8x128xf32>,
    %c8_i32 = arith.constant 8 : i32
    %c0_54 = arith.constant 0 : index
    %c0_55 = arith.constant 0 : index
    %224 = vector.load %arg5[%c0_54, %c0_55] : memref<8x128xf32, #tpu.memory_space<vmem>>, vector<8x128xf32>
    tpu.vector_store %arg5[%c0_54, %c0_55], %219 {strides = array<i32>} : memref<8x128xf32, #tpu.memory_space<vmem>>, vector<8x128xf32>,
    return
  }
  func.func @transform_0(%arg0: i32) -> (i32, i32, i32) {
    %c0_i32 = arith.constant 0 : i32
    %c0_i32_0 = arith.constant 0 : i32
    %c0_i32_1 = arith.constant 0 : i32
    return %arg0, %c0_i32, %c0_i32_0 : i32, i32, i32
  }
  func.func @transform_1(%arg0: i32) -> (i32, i32) {
    %c0_i32 = arith.constant 0 : i32
    %c0_i32_0 = arith.constant 0 : i32
    %c0_i32_1 = arith.constant 0 : i32
    return %c0_i32, %c0_i32_0 : i32, i32
  }
  func.func @transform_2(%arg0: i32) -> (i32, i32) {
    %c0_i32 = arith.constant 0 : i32
    %c0_i32_0 = arith.constant 0 : i32
    %c0_i32_1 = arith.constant 0 : i32
    return %c0_i32, %c0_i32_0 : i32, i32
  }
  func.func @transform_3(%arg0: i32) -> (i32, i32, i32) {
    %c0_i32 = arith.constant 0 : i32
    %c0_i32_0 = arith.constant 0 : i32
    %c0_i32_1 = arith.constant 0 : i32
    return %arg0, %c0_i32, %c0_i32_0 : i32, i32, i32
  }
}

</mosaic_0001>

<bundles_post_ra>
// kernel: encoder_rnn_forward.1
= control target key start
LH: loop header
LB: loop body
LE: loop exit
PB: predicated region body
PF: predicated region fallthrough
CT: control target
= control target key end

     0   :  { %v2414_v3 = vmov 0.0|0.0   ;;  %v2415_v4 = vmov 0.0   ;;  %vm2416_vm0 = vmmov 0   ;;  %s3056_s1 = inlined_call_operand.vmem [shape: f32[128,384], index: 1, kind: input, shape index: {}]   ;;  %s3057_s0 = inlined_call_operand.vmem [shape: f32[8,8,384], index: 0, kind: input, shape index: {}]   ;;  %s3058_s2 = inlined_call_operand.vmem [shape: f32[1,128], index: 2, kind: input, shape index: {}]   ;;  %s3059_s3 = inlined_call_operand.vmem [shape: f32[8,8,128], index: 3, kind: output, shape index: {}]  }
   0x1   :  { %v20_v0 = vld [vmem:[%s3056_s1 + $0x8] sm:$0xff]  ;;  %v23_v1 = vld [vmem:[%s3056_s1 + $0x20] sm:$0xff]  ;;  %1915 = vmatprep.subr.bf16.mxu1 %v2414_v3  ;;  %142 = vmatprep.mubr.f32.mxu0 %v2415_v4  ;;  %v22_v6 = vld [vmem:[%s3056_s1 + $0x18] sm:$0xff] }
   0x2   :  { %v19_v2 = vld [vmem:[%s3056_s1] sm:$0xff]  ;;  %v2448_v5 = vpack.c.bf16 %v23_v1, %v20_v0  ;;  %v26_v7 = vld [vmem:[%s3056_s1 + $0x38] sm:$0xff]  ;;  %v29_v8 = vld [vmem:[%s3056_s1 + $0x50] sm:$0xff]  ;;  %1635 = vmatprep.mubr.msk.f32.mxu1 %vm2416_vm0, %v2415_v4 }
   0x3   :  { %v2461_v9 = vpack.c.bf16 %v22_v6, %v19_v2  ;;  %v2463_v10 = vpack.c.bf16 %v29_v8, %v26_v7  ;;  %v25_v11 = vld [vmem:[%s3056_s1 + $0x30] sm:$0xff]  ;;  %v28_v12 = vld [vmem:[%s3056_s1 + $0x48] sm:$0xff]  ;;  %v35_v14 = vld [vmem:[%s3056_s1 + $0x80] sm:$0xff] }
   0x4   :  { %v32_v13 = vld [vmem:[%s3056_s1 + $0x68] sm:$0xff]  ;;  %1884 = vmatprep.subr.bf16.mxu0 %v2448_v5  ;;  %v2479_v15 = vpack.c.bf16 %v28_v12, %v25_v11  ;;  %v31_v17 = vld [vmem:[%s3056_s1 + $0x60] sm:$0xff]  ;;  %v34_v18 = vld [vmem:[%s3056_s1 + $0x78] sm:$0xff] }
   0x5   :  { %1886 = vmatpush1.bf16.msra.mxu0 %v2461_v9  ;;  %v2482_v16 = vpack.c.bf16 %v35_v14, %v32_v13  ;;  %v38_v19 = vld [vmem:[%s3056_s1 + $0x98] sm:$0xff]  ;;  %v41_v20 = vld [vmem:[%s3056_s1 + $0xb0] sm:$0xff]  ;;  %v2497_v21 = vpack.c.bf16 %v34_v18, %v31_v17  ;;  %v40_v24 = vld [vmem:[%s3056_s1 + $0xa8] sm:$0xff] }
   0x6   :  { %1888 = vmatprep.subr.bf16.mxu0 %v2463_v10  ;;  %v37_v22 = vld [vmem:[%s3056_s1 + $0x90] sm:$0xff]  ;;  %v2503_v23 = vpack.c.bf16 %v41_v20, %v38_v19  ;;  %v24_v26 = vld [vmem:[%s3056_s1 + $0x28] sm:$0xff]  ;;  %v47_v28 = vld [vmem:[%s3056_s1 + $0xe0] sm:$0xff] }
   0x7   :  { %v21_v25 = vld [vmem:[%s3056_s1 + $0x10] sm:$0xff]  ;;  %v44_v27 = vld [vmem:[%s3056_s1 + $0xc8] sm:$0xff]  ;;  %v27_v30 = vld [vmem:[%s3056_s1 + $0x40] sm:$0xff]  ;;  %v2529_v32 = vpack.c.bf16 %v40_v24, %v37_v22 }
   0x8   :  { %v2520_v29 = vpack.c.bf16 %v24_v26, %v21_v25  ;;  %v30_v31 = vld [vmem:[%s3056_s1 + $0x58] sm:$0xff]  ;;  %v43_v33 = vld [vmem:[%s3056_s1 + $0xc0] sm:$0xff]  ;;  %v2538_v35 = vpack.c.bf16 %v47_v28, %v44_v27  ;;  %v33_v37 = vld [vmem:[%s3056_s1 + $0x70] sm:$0xff] }
   0x9   :  { %1890 = vmatpush1.bf16.msra.mxu0 %v2479_v15  ;;  %v2535_v34 = vpack.c.bf16 %v30_v31, %v27_v30  ;;  %v46_v36 = vld [vmem:[%s3056_s1 + $0xd8] sm:$0xff]  ;;  %v36_v38 = vld [vmem:[%s3056_s1 + $0x88] sm:$0xff]  ;;  %v53_v40 = vld [vmem:[%s3056_s1 + $0x110] sm:$0xff] }
   0xa   :  { %1892 = vmatprep.subr.bf16.mxu0 %v2482_v16  ;;  %1917 = vmatpush3.bf16.msra.mxu1 %v2520_v29  ;;  %v50_v39 = vld [vmem:[%s3056_s1 + $0xf8] sm:$0xff]  ;;  %v2557_v41 = vpack.c.bf16 %v46_v36, %v43_v33  ;;  %v49_v42 = vld [vmem:[%s3056_s1 + $0xf0] sm:$0xff]  ;;  %v2563_v43 = vpack.c.bf16 %v36_v38, %v33_v37  ;;  %v52_v45 = vld [vmem:[%s3056_s1 + $0x108] sm:$0xff] }
   0xb   :  { %1918 = vmatprep.subr.bf16.mxu1 %v2414_v3  ;;  %v2566_v44 = vpack.c.bf16 %v53_v40, %v50_v39  ;;  %v39_v46 = vld [vmem:[%s3056_s1 + $0xa0] sm:$0xff]  ;;  %v42_v47 = vld [vmem:[%s3056_s1 + $0xb8] sm:$0xff]  ;;  %v56_v48 = vld [vmem:[%s3056_s1 + $0x128] sm:$0xff]  ;;  %v2585_v50 = vpack.c.bf16 %v52_v45, %v49_v42 }
   0xc   :  { %v59_v49 = vld [vmem:[%s3056_s1 + $0x140] sm:$0xff]  ;;  %v2591_v52 = vpack.c.bf16 %v42_v47, %v39_v46  ;;  %v58_v54 = vld [vmem:[%s3056_s1 + $0x138] sm:$0xff]  ;;  %v45_v55 = vld [vmem:[%s3056_s1 + $0xd0] sm:$0xff] }
   0xd   :  { %1894 = vmatpush1.bf16.msra.mxu0 %v2497_v21  ;;  %v55_v51 = vld [vmem:[%s3056_s1 + $0x120] sm:$0xff]  ;;  %v2594_v53 = vpack.c.bf16 %v59_v49, %v56_v48  ;;  %v48_v56 = vld [vmem:[%s3056_s1 + $0xe8] sm:$0xff]  ;;  %v62_v57 = vld [vmem:[%s3056_s1 + $0x158] sm:$0xff] }
   0xe   :  { %1896 = vmatprep.subr.bf16.mxu0 %v2503_v23  ;;  %1920 = vmatpush3.bf16.msra.mxu1 %v2535_v34  ;;  %v65_v58 = vld [vmem:[%s3056_s1 + $0x170] sm:$0xff]  ;;  %v2613_v59 = vpack.c.bf16 %v58_v54, %v55_v51  ;;  %v2619_v61 = vpack.c.bf16 %v48_v56, %v45_v55  ;;  %v64_v63 = vld [vmem:[%s3056_s1 + $0x168] sm:$0xff]  ;;  %v51_v0 = vld [vmem:[%s3056_s1 + $0x100] sm:$0xff] }
   0xf   :  { %1921 = vmatprep.subr.bf16.mxu1 %v2414_v3  ;;  %v61_v60 = vld [vmem:[%s3056_s1 + $0x150] sm:$0xff]  ;;  %v2622_v62 = vpack.c.bf16 %v65_v58, %v62_v57  ;;  %v54_v1 = vld [vmem:[%s3056_s1 + $0x118] sm:$0xff]  ;;  %v60_v8 = vld [vmem:[%s3056_s1 + $0x148] sm:$0xff] }
  0x10   :  { %v2635_v2 = vpack.c.bf16 %v64_v63, %v61_v60  ;;  %v2638_v6 = vpack.c.bf16 %v54_v1, %v51_v0  ;;  %v57_v7 = vld [vmem:[%s3056_s1 + $0x130] sm:$0xff]  ;;  %v63_v12 = vld [vmem:[%s3056_s1 + $0x160] sm:$0xff]  ;;  %v66_v13 = vld [vmem:[%s3056_s1 + $0x178] sm:$0xff] }
  0x11   :  { %1898 = vmatpush1.bf16.msra.mxu0 %v2529_v32  ;;  %v2650_v11 = vpack.c.bf16 %v60_v8, %v57_v7  ;;  %v2662_v14 = vpack.c.bf16 %v66_v13, %v63_v12  ;;  %v75_v17 = vld [vmem:[%s3057_s0] sm:$0xff]  ;;  %v76_v24 = vld [vmem:[%s3057_s0 + $0x8] sm:$0xff]  ;;  %v77_v39 = vld [vmem:[%s3057_s0 + $0x10] sm:$0xff] }
  0x12   :  { %1900 = vmatprep.subr.bf16.mxu0 %v2538_v35  ;;  %1923 = vmatpush3.bf16.msra.mxu1 %v2563_v43  ;;  %v2712_v33 = vld [vmem:[%s3058_s2] ss:$0 sm:$0xff]  ;;  %v1425_v54 = vld [vmem:[%s3057_s0 + $0x18] sm:$0xff] }
  0x13   :  { %1924 = vmatprep.subr.bf16.mxu1 %v2414_v3  ;;  %v1426_v0 = vld [vmem:[%s3057_s0 + $0x20] sm:$0xff] }
  0x15   :  { %1902 = vmatpush1.bf16.msra.mxu0 %v2557_v41 }
  0x16   :  { %1904 = vmatprep.subr.bf16.mxu0 %v2566_v44  ;;  %1926 = vmatpush3.bf16.msra.mxu1 %v2591_v52 }
  0x17   :  { %1927 = vmatprep.subr.bf16.mxu1 %v2414_v3 }
  0x19   :  { %1906 = vmatpush1.bf16.msra.mxu0 %v2585_v50 }
  0x1a   :  { %1908 = vmatprep.subr.bf16.mxu0 %v2594_v53  ;;  %1929 = vmatpush3.bf16.msra.mxu1 %v2619_v61 }
  0x1b   :  { %1930 = vmatprep.subr.bf16.mxu1 %v2414_v3 }
  0x1d   :  { %1910 = vmatpush1.bf16.msra.mxu0 %v2613_v59 }
  0x1e   :  { %1912 = vmatprep.subr.bf16.mxu0 %v2622_v62  ;;  %1932 = vmatpush3.bf16.msra.mxu1 %v2638_v6 }
  0x1f   :  { %1933 = vmatprep.subr.bf16.mxu1 %v2414_v3 }
  0x21   :  { %1914 = vmatpush1.bf16.msra.mxu0 %v2635_v2 }
  0x22   :  { %1940 = vmatprep.subr.bf16.mxu0 %v2448_v5  ;;  %1935 = vmatpush3.bf16.msra.mxu1 %v2650_v11 }
  0x23   :  { %1936 = vmatprep.subr.bf16.mxu1 %v2414_v3 }
  0x24   :  { %143 = vmatmul.mubr.f32.vlgmr.msra.gmra.mrb[0].mxu0 %v2415_v4 }
  0x25   :  { %1942 = vmatpush1.bf16.msra.mxu0 %v2461_v9  ;;  %309 = vmatprep.mubr.f32.mxu0 %v2415_v4 }
  0x26   :  { %1944 = vmatprep.subr.bf16.mxu0 %v2463_v10  ;;  %1938 = vmatpush3.bf16.msra.mxu1 %v2662_v14 }
  0x27   :  { %1971 = vmatprep.subr.bf16.mxu1 %v2414_v3 }
  0x29   :  { %1946 = vmatpush1.bf16.msra.mxu0 %v2479_v15  ;;  %1636 = vmatmul.mubr.f32.vlgmr.msra.gmra.mrb[0].mxu1 %v2415_v4 }
  0x2a   :  { %1948 = vmatprep.subr.bf16.mxu0 %v2482_v16  ;;  %1973 = vmatpush3.bf16.msra.mxu1 %v2520_v29 }
  0x2b   :  { %1974 = vmatprep.subr.bf16.mxu1 %v2414_v3  ;;  %1670 = vmatprep.mubr.msk.f32.mxu1 %vm2416_vm0, %v2415_v4 }
  0x2d   :  { %1950 = vmatpush1.bf16.msra.mxu0 %v2497_v21 }
  0x2e   :  { %1952 = vmatprep.subr.bf16.mxu0 %v2503_v23  ;;  %1976 = vmatpush3.bf16.msra.mxu1 %v2535_v34 }
  0x2f   :  { %1977 = vmatprep.subr.bf16.mxu1 %v2414_v3 }
  0x31   :  { %1954 = vmatpush1.bf16.msra.mxu0 %v2529_v32 }
  0x32   :  { %1956 = vmatprep.subr.bf16.mxu0 %v2538_v35  ;;  %1979 = vmatpush3.bf16.msra.mxu1 %v2563_v43 }
  0x33   :  { %1980 = vmatprep.subr.bf16.mxu1 %v2414_v3 }
  0x35   :  { %1958 = vmatpush1.bf16.msra.mxu0 %v2557_v41 }
  0x36   :  { %1960 = vmatprep.subr.bf16.mxu0 %v2566_v44  ;;  %1982 = vmatpush3.bf16.msra.mxu1 %v2591_v52 }
  0x37   :  { %1983 = vmatprep.subr.bf16.mxu1 %v2414_v3 }
  0x39   :  { %1962 = vmatpush1.bf16.msra.mxu0 %v2585_v50 }
  0x3a   :  { %1964 = vmatprep.subr.bf16.mxu0 %v2594_v53  ;;  %1985 = vmatpush3.bf16.msra.mxu1 %v2619_v61 }
  0x3b   :  { %1986 = vmatprep.subr.bf16.mxu1 %v2414_v3 }
  0x3d   :  { %1966 = vmatpush1.bf16.msra.mxu0 %v2613_v59 }
  0x3e   :  { %1968 = vmatprep.subr.bf16.mxu0 %v2622_v62  ;;  %1988 = vmatpush3.bf16.msra.mxu1 %v2638_v6 }
  0x3f   :  { %1989 = vmatprep.subr.bf16.mxu1 %v2414_v3 }
  0x41   :  { %1970 = vmatpush1.bf16.msra.mxu0 %v2635_v2 }
  0x42   :  { %1996 = vmatprep.subr.bf16.mxu0 %v2448_v5  ;;  %1991 = vmatpush3.bf16.msra.mxu1 %v2650_v11 }
  0x43   :  { %1992 = vmatprep.subr.bf16.mxu1 %v2414_v3 }
  0x46   :  { %1994 = vmatpush3.bf16.msra.mxu1 %v2662_v14 }
  0x47   :  { %2027 = vmatprep.subr.bf16.mxu1 %v2414_v3 }
  0xf7   :  { %v144_v18 = vpop.f32.mrb[0].mxu0 }
  0xf8   :  { %v219_v19 = vadd.f32 %v144_v18, %v75_v17  ;;  %v146_v20 = vpop.f32.mrb[1].mxu0 }
  0xf9   :  { %v220_v26 = vadd.f32 %v146_v20, %v76_v24 }
  0xfa   :  { %v1423_v22 = vmul.f32 -1.442695, %v219_v19  ;;  %v1427_v19 = vld [vmem:[%s3057_s0 + $0x28] sm:$0xff] }
  0xfb   :  { %v1424_v28 = vmul.f32 -1.442695, %v220_v26 }
  0xfc   :  { %2334 = vpow2.f32 %v1423_v22  ;;  %v215_v25 = vpop.f32.mrb[0].mxu1 }
  0xfd   :  { %v1637_v27 = vpop.f32.mrb[1].mxu1  ;;  %2336 = vpow2.f32 %v1424_v28  ;;  %v233_v36 = vadd.f32 %v2712_v33, %v215_v25 }
 0x106   :  { %v2335_v30 = vpop.eup %2334 }
 0x107   :  { %v227_v31 = vadd.f32 1.0, %v2335_v30  ;;  %v2337_v37 = vpop.eup %2336 }
 0x108   :  { %v228_v42 = vadd.f32 1.0, %v2337_v37 }
 0x109   :  { %2338 = vrcp.f32 %v227_v31  ;;  %v1431_v31 = vld [vmem:[%s3057_s0 + $0x30] sm:$0xff] }
 0x113   :  { %v2339_v38 = vpop.eup %2338 }
 0x114   :  { %v234_v40 = vmul.f32 %v2339_v38, %v233_v36 }
 0x116   :  { %v235_v45 = vadd.f32 %v234_v40, %v77_v39 }
 0x118   :  { %2340 = vtanh.f32 %v235_v45  ;;  %v1432_v45 = vld [vmem:[%s3057_s0 + $0x38] sm:$0xff] }
 0x119   :  { %2342 = vrcp.f32 %v228_v42 }
 0x122   :  { %v2341_v46 = vpop.eup %2340 }
 0x123   :  { %v237_v47 = vsub.f32 0.0, %v2341_v46  ;;  %v2343_v48 = vpop.eup %2342 }
 0x125   :  { %v238_v49 = vmul.f32 %v2343_v48, %v237_v47 }
 0x127   :  { %v2718_v51 = vadd.f32 %v2341_v46, %v238_v49 }
 0x129   :  { %240 = vst [vmem:[%s3059_s3] sm:$0xff] %v2718_v51  ;;  %310 = vmatmul.mubr.f32.vlgmr.msra.gmra.mrb[2].mxu0 %v2718_v51  ;;  %1671 = vmatmul.mubr.f32.vlgmr.msra.gmra.mrb[2].mxu1 %v2718_v51 }
 0x12a   :  { %1998 = vmatpush1.bf16.msra.mxu0 %v2461_v9  ;;  %2029 = vmatpush3.bf16.msra.mxu1 %v2520_v29 }
 0x12b   :  { %2000 = vmatprep.subr.bf16.mxu0 %v2463_v10  ;;  %2030 = vmatprep.subr.bf16.mxu1 %v2414_v3 }
 0x12c   :  { %477 = vmatprep.mubr.f32.mxu0 %v2415_v4  ;;  %1705 = vmatprep.mubr.msk.f32.mxu1 %vm2416_vm0, %v2415_v4 }
 0x12e   :  { %2002 = vmatpush1.bf16.msra.mxu0 %v2479_v15  ;;  %2032 = vmatpush3.bf16.msra.mxu1 %v2535_v34 }
 0x12f   :  { %2004 = vmatprep.subr.bf16.mxu0 %v2482_v16  ;;  %2033 = vmatprep.subr.bf16.mxu1 %v2414_v3 }
 0x132   :  { %2006 = vmatpush1.bf16.msra.mxu0 %v2497_v21  ;;  %2035 = vmatpush3.bf16.msra.mxu1 %v2563_v43 }
 0x133   :  { %2008 = vmatprep.subr.bf16.mxu0 %v2503_v23  ;;  %2036 = vmatprep.subr.bf16.mxu1 %v2414_v3 }
 0x136   :  { %2010 = vmatpush1.bf16.msra.mxu0 %v2529_v32  ;;  %2038 = vmatpush3.bf16.msra.mxu1 %v2591_v52 }
 0x137   :  { %2012 = vmatprep.subr.bf16.mxu0 %v2538_v35  ;;  %2039 = vmatprep.subr.bf16.mxu1 %v2414_v3 }
 0x13a   :  { %2014 = vmatpush1.bf16.msra.mxu0 %v2557_v41  ;;  %2041 = vmatpush3.bf16.msra.mxu1 %v2619_v61 }
 0x13b   :  { %2016 = vmatprep.subr.bf16.mxu0 %v2566_v44  ;;  %2042 = vmatprep.subr.bf16.mxu1 %v2414_v3 }
 0x13e   :  { %2018 = vmatpush1.bf16.msra.mxu0 %v2585_v50  ;;  %2044 = vmatpush3.bf16.msra.mxu1 %v2638_v6 }
 0x13f   :  { %2020 = vmatprep.subr.bf16.mxu0 %v2594_v53  ;;  %2045 = vmatprep.subr.bf16.mxu1 %v2414_v3 }
 0x142   :  { %2022 = vmatpush1.bf16.msra.mxu0 %v2613_v59  ;;  %2047 = vmatpush3.bf16.msra.mxu1 %v2650_v11 }
 0x143   :  { %2024 = vmatprep.subr.bf16.mxu0 %v2622_v62  ;;  %2048 = vmatprep.subr.bf16.mxu1 %v2414_v3 }
 0x146   :  { %2026 = vmatpush1.bf16.msra.mxu0 %v2635_v2  ;;  %2050 = vmatpush3.bf16.msra.mxu1 %v2662_v14 }
 0x147   :  { %2052 = vmatprep.subr.bf16.mxu0 %v2448_v5  ;;  %2083 = vmatprep.subr.bf16.mxu1 %v2414_v3 }
 0x1fc   :  { %v311_v55 = vpop.f32.mrb[2].mxu0  ;;  %v382_v56 = vpop.f32.mrb[2].mxu1 }
 0x1fd   :  { %v386_v57 = vadd.f32 %v1425_v54, %v311_v55  ;;  %v313_v58 = vpop.f32.mrb[3].mxu0  ;;  %v1672_v60 = vpop.f32.mrb[3].mxu1  ;;  %v400_v17 = vadd.f32 %v2712_v33, %v382_v56  ;;  %v1433_v56 = vld [vmem:[%s3057_s0 + $0x40] sm:$0xff] }
 0x1fe   :  { %v387_v1 = vadd.f32 %v1426_v0, %v313_v58 }
 0x1ff   :  { %v1428_v63 = vmul.f32 -1.442695, %v386_v57 }
 0x200   :  { %v1429_v7 = vmul.f32 -1.442695, %v387_v1 }
 0x201   :  { %2344 = vpow2.f32 %v1428_v63 }
 0x202   :  { %2346 = vpow2.f32 %v1429_v7 }
 0x20b   :  { %v2345_v8 = vpop.eup %2344 }
 0x20c   :  { %v394_v12 = vadd.f32 1.0, %v2345_v8  ;;  %v2347_v13 = vpop.eup %2346 }
 0x20d   :  { %v395_v24 = vadd.f32 1.0, %v2347_v13 }
 0x20e   :  { %2348 = vrcp.f32 %v394_v12  ;;  %v1437_v12 = vld [vmem:[%s3057_s0 + $0x48] sm:$0xff] }
 0x218   :  { %v2349_v18 = vpop.eup %2348 }
 0x219   :  { %v401_v20 = vmul.f32 %v2349_v18, %v400_v17 }
 0x21b   :  { %v402_v22 = vadd.f32 %v1427_v19, %v401_v20 }
 0x21d   :  { %2350 = vtanh.f32 %v402_v22 }
 0x21e   :  { %2352 = vrcp.f32 %v395_v24  ;;  %v1438_v24 = vld [vmem:[%s3057_s0 + $0x50] sm:$0xff] }
 0x227   :  { %v2351_v25 = vpop.eup %2350 }
 0x228   :  { %v404_v26 = vsub.f32 %v2718_v51, %v2351_v25  ;;  %v2353_v27 = vpop.eup %2352 }
 0x22a   :  { %v405_v28 = vmul.f32 %v2353_v27, %v404_v26 }
 0x22c   :  { %v2772_v30 = vadd.f32 %v2351_v25, %v405_v28 }
 0x22e   :  { %1430 = vst [vmem:[%s3059_s3 + $0x8] sm:$0xff] %v2772_v30  ;;  %478 = vmatmul.mubr.f32.vlgmr.msra.gmra.mrb[4].mxu0 %v2772_v30  ;;  %1706 = vmatmul.mubr.f32.vlgmr.msra.gmra.mrb[4].mxu1 %v2772_v30 }
 0x22f   :  { %2054 = vmatpush1.bf16.msra.mxu0 %v2461_v9  ;;  %2085 = vmatpush3.bf16.msra.mxu1 %v2520_v29 }
 0x230   :  { %2056 = vmatprep.subr.bf16.mxu0 %v2463_v10  ;;  %2086 = vmatprep.subr.bf16.mxu1 %v2414_v3 }
 0x231   :  { %645 = vmatprep.mubr.f32.mxu0 %v2415_v4  ;;  %1740 = vmatprep.mubr.msk.f32.mxu1 %vm2416_vm0, %v2415_v4 }
 0x233   :  { %2058 = vmatpush1.bf16.msra.mxu0 %v2479_v15  ;;  %2088 = vmatpush3.bf16.msra.mxu1 %v2535_v34 }
 0x234   :  { %2060 = vmatprep.subr.bf16.mxu0 %v2482_v16  ;;  %2089 = vmatprep.subr.bf16.mxu1 %v2414_v3 }
 0x237   :  { %2062 = vmatpush1.bf16.msra.mxu0 %v2497_v21  ;;  %2091 = vmatpush3.bf16.msra.mxu1 %v2563_v43 }
 0x238   :  { %2064 = vmatprep.subr.bf16.mxu0 %v2503_v23  ;;  %2092 = vmatprep.subr.bf16.mxu1 %v2414_v3 }
 0x23b   :  { %2066 = vmatpush1.bf16.msra.mxu0 %v2529_v32  ;;  %2094 = vmatpush3.bf16.msra.mxu1 %v2591_v52 }
 0x23c   :  { %2068 = vmatprep.subr.bf16.mxu0 %v2538_v35  ;;  %2095 = vmatprep.subr.bf16.mxu1 %v2414_v3 }
 0x23f   :  { %2070 = vmatpush1.bf16.msra.mxu0 %v2557_v41  ;;  %2097 = vmatpush3.bf16.msra.mxu1 %v2619_v61 }
 0x240   :  { %2072 = vmatprep.subr.bf16.mxu0 %v2566_v44  ;;  %2098 = vmatprep.subr.bf16.mxu1 %v2414_v3 }
 0x243   :  { %2074 = vmatpush1.bf16.msra.mxu0 %v2585_v50  ;;  %2100 = vmatpush3.bf16.msra.mxu1 %v2638_v6 }
 0x244   :  { %2076 = vmatprep.subr.bf16.mxu0 %v2594_v53  ;;  %2101 = vmatprep.subr.bf16.mxu1 %v2414_v3 }
 0x247   :  { %2078 = vmatpush1.bf16.msra.mxu0 %v2613_v59  ;;  %2103 = vmatpush3.bf16.msra.mxu1 %v2650_v11 }
 0x248   :  { %2080 = vmatprep.subr.bf16.mxu0 %v2622_v62  ;;  %2104 = vmatprep.subr.bf16.mxu1 %v2414_v3 }
 0x24b   :  { %2082 = vmatpush1.bf16.msra.mxu0 %v2635_v2  ;;  %2106 = vmatpush3.bf16.msra.mxu1 %v2662_v14 }
 0x24c   :  { %2108 = vmatprep.subr.bf16.mxu0 %v2448_v5  ;;  %2139 = vmatprep.subr.bf16.mxu1 %v2414_v3 }
 0x301   :  { %v479_v36 = vpop.f32.mrb[4].mxu0  ;;  %v550_v37 = vpop.f32.mrb[4].mxu1 }
 0x302   :  { %v554_v38 = vadd.f32 %v1431_v31, %v479_v36  ;;  %v481_v39 = vpop.f32.mrb[5].mxu0  ;;  %v1707_v40 = vpop.f32.mrb[5].mxu1  ;;  %v568_v54 = vadd.f32 %v2712_v33, %v550_v37  ;;  %v1439_v37 = vld [vmem:[%s3057_s0 + $0x58] sm:$0xff] }
 0x303   :  { %v555_v46 = vadd.f32 %v1432_v45, %v481_v39 }
 0x304   :  { %v1434_v42 = vmul.f32 -1.442695, %v554_v38 }
 0x305   :  { %v1435_v47 = vmul.f32 -1.442695, %v555_v46 }
 0x306   :  { %2354 = vpow2.f32 %v1434_v42 }
 0x307   :  { %2356 = vpow2.f32 %v1435_v47 }
 0x310   :  { %v2355_v48 = vpop.eup %2354 }
 0x311   :  { %v562_v49 = vadd.f32 1.0, %v2355_v48  ;;  %v2357_v51 = vpop.eup %2356 }
 0x312   :  { %v563_v60 = vadd.f32 1.0, %v2357_v51 }
 0x313   :  { %2358 = vrcp.f32 %v562_v49  ;;  %v1443_v49 = vld [vmem:[%s3057_s0 + $0x60] sm:$0xff] }
 0x31d   :  { %v2359_v55 = vpop.eup %2358 }
 0x31e   :  { %v569_v57 = vmul.f32 %v2359_v55, %v568_v54 }
 0x320   :  { %v570_v58 = vadd.f32 %v1433_v56, %v569_v57 }
 0x322   :  { %2360 = vtanh.f32 %v570_v58 }
 0x323   :  { %2362 = vrcp.f32 %v563_v60  ;;  %v1444_v60 = vld [vmem:[%s3057_s0 + $0x68] sm:$0xff] }
 0x32c   :  { %v2361_v63 = vpop.eup %2360 }
 0x32d   :  { %v572_v0 = vsub.f32 %v2772_v30, %v2361_v63  ;;  %v2363_v1 = vpop.eup %2362 }
 0x32f   :  { %v573_v7 = vmul.f32 %v2363_v1, %v572_v0 }
 0x331   :  { %v2826_v8 = vadd.f32 %v2361_v63, %v573_v7 }
 0x333   :  { %1436 = vst [vmem:[%s3059_s3 + $0x10] sm:$0xff] %v2826_v8  ;;  %646 = vmatmul.mubr.f32.vlgmr.msra.gmra.mrb[6].mxu0 %v2826_v8  ;;  %1741 = vmatmul.mubr.f32.vlgmr.msra.gmra.mrb[6].mxu1 %v2826_v8 }
 0x334   :  { %2110 = vmatpush1.bf16.msra.mxu0 %v2461_v9  ;;  %2141 = vmatpush3.bf16.msra.mxu1 %v2520_v29 }
 0x335   :  { %2112 = vmatprep.subr.bf16.mxu0 %v2463_v10  ;;  %2142 = vmatprep.subr.bf16.mxu1 %v2414_v3 }
 0x336   :  { %813 = vmatprep.mubr.f32.mxu0 %v2415_v4  ;;  %1775 = vmatprep.mubr.msk.f32.mxu1 %vm2416_vm0, %v2415_v4 }
 0x338   :  { %2114 = vmatpush1.bf16.msra.mxu0 %v2479_v15  ;;  %2144 = vmatpush3.bf16.msra.mxu1 %v2535_v34 }
 0x339   :  { %2116 = vmatprep.subr.bf16.mxu0 %v2482_v16  ;;  %2145 = vmatprep.subr.bf16.mxu1 %v2414_v3 }
 0x33c   :  { %2118 = vmatpush1.bf16.msra.mxu0 %v2497_v21  ;;  %2147 = vmatpush3.bf16.msra.mxu1 %v2563_v43 }
 0x33d   :  { %2120 = vmatprep.subr.bf16.mxu0 %v2503_v23  ;;  %2148 = vmatprep.subr.bf16.mxu1 %v2414_v3 }
 0x340   :  { %2122 = vmatpush1.bf16.msra.mxu0 %v2529_v32  ;;  %2150 = vmatpush3.bf16.msra.mxu1 %v2591_v52 }
 0x341   :  { %2124 = vmatprep.subr.bf16.mxu0 %v2538_v35  ;;  %2151 = vmatprep.subr.bf16.mxu1 %v2414_v3 }
 0x344   :  { %2126 = vmatpush1.bf16.msra.mxu0 %v2557_v41  ;;  %2153 = vmatpush3.bf16.msra.mxu1 %v2619_v61 }
 0x345   :  { %2128 = vmatprep.subr.bf16.mxu0 %v2566_v44  ;;  %2154 = vmatprep.subr.bf16.mxu1 %v2414_v3 }
 0x348   :  { %2130 = vmatpush1.bf16.msra.mxu0 %v2585_v50  ;;  %2156 = vmatpush3.bf16.msra.mxu1 %v2638_v6 }
 0x349   :  { %2132 = vmatprep.subr.bf16.mxu0 %v2594_v53  ;;  %2157 = vmatprep.subr.bf16.mxu1 %v2414_v3 }
 0x34c   :  { %2134 = vmatpush1.bf16.msra.mxu0 %v2613_v59  ;;  %2159 = vmatpush3.bf16.msra.mxu1 %v2650_v11 }
 0x34d   :  { %2136 = vmatprep.subr.bf16.mxu0 %v2622_v62  ;;  %2160 = vmatprep.subr.bf16.mxu1 %v2414_v3 }
 0x350   :  { %2138 = vmatpush1.bf16.msra.mxu0 %v2635_v2  ;;  %2162 = vmatpush3.bf16.msra.mxu1 %v2662_v14 }
 0x351   :  { %2164 = vmatprep.subr.bf16.mxu0 %v2448_v5  ;;  %2195 = vmatprep.subr.bf16.mxu1 %v2414_v3 }
 0x406   :  { %v647_v13 = vpop.f32.mrb[6].mxu0  ;;  %v718_v17 = vpop.f32.mrb[6].mxu1 }
 0x407   :  { %v722_v18 = vadd.f32 %v1437_v12, %v647_v13  ;;  %v649_v19 = vpop.f32.mrb[7].mxu0  ;;  %v1742_v20 = vpop.f32.mrb[7].mxu1  ;;  %v736_v31 = vadd.f32 %v2712_v33, %v718_v17  ;;  %v1445_v17 = vld [vmem:[%s3057_s0 + $0x70] sm:$0xff] }
 0x408   :  { %v723_v25 = vadd.f32 %v1438_v24, %v649_v19 }
 0x409   :  { %v1440_v22 = vmul.f32 -1.442695, %v722_v18 }
 0x40a   :  { %v1441_v26 = vmul.f32 -1.442695, %v723_v25 }
 0x40b   :  { %2364 = vpow2.f32 %v1440_v22 }
 0x40c   :  { %2366 = vpow2.f32 %v1441_v26 }
 0x415   :  { %v2365_v27 = vpop.eup %2364 }
 0x416   :  { %v730_v28 = vadd.f32 1.0, %v2365_v27  ;;  %v2367_v30 = vpop.eup %2366 }
 0x417   :  { %v731_v40 = vadd.f32 1.0, %v2367_v30 }
 0x418   :  { %2368 = vrcp.f32 %v730_v28  ;;  %v1449_v28 = vld [vmem:[%s3057_s0 + $0x78] sm:$0xff] }
 0x422   :  { %v2369_v36 = vpop.eup %2368 }
 0x423   :  { %v737_v38 = vmul.f32 %v2369_v36, %v736_v31 }
 0x425   :  { %v738_v39 = vadd.f32 %v1439_v37, %v737_v38 }
 0x427   :  { %2370 = vtanh.f32 %v738_v39 }
 0x428   :  { %2372 = vrcp.f32 %v731_v40  ;;  %v1450_v40 = vld [vmem:[%s3057_s0 + $0x80] sm:$0xff] }
 0x431   :  { %v2371_v42 = vpop.eup %2370 }
 0x432   :  { %v740_v45 = vsub.f32 %v2826_v8, %v2371_v42  ;;  %v2373_v46 = vpop.eup %2372 }
 0x434   :  { %v741_v47 = vmul.f32 %v2373_v46, %v740_v45 }
 0x436   :  { %v2880_v48 = vadd.f32 %v2371_v42, %v741_v47 }
 0x438   :  { %1442 = vst [vmem:[%s3059_s3 + $0x18] sm:$0xff] %v2880_v48  ;;  %814 = vmatmul.mubr.f32.vlgmr.msra.gmra.mrb[8].mxu0 %v2880_v48  ;;  %1776 = vmatmul.mubr.f32.vlgmr.msra.gmra.mrb[8].mxu1 %v2880_v48 }
 0x439   :  { %2166 = vmatpush1.bf16.msra.mxu0 %v2461_v9  ;;  %2197 = vmatpush3.bf16.msra.mxu1 %v2520_v29 }
 0x43a   :  { %2168 = vmatprep.subr.bf16.mxu0 %v2463_v10  ;;  %2198 = vmatprep.subr.bf16.mxu1 %v2414_v3 }
 0x43b   :  { %981 = vmatprep.mubr.f32.mxu0 %v2415_v4  ;;  %1810 = vmatprep.mubr.msk.f32.mxu1 %vm2416_vm0, %v2415_v4 }
 0x43d   :  { %2170 = vmatpush1.bf16.msra.mxu0 %v2479_v15  ;;  %2200 = vmatpush3.bf16.msra.mxu1 %v2535_v34 }
 0x43e   :  { %2172 = vmatprep.subr.bf16.mxu0 %v2482_v16  ;;  %2201 = vmatprep.subr.bf16.mxu1 %v2414_v3 }
 0x441   :  { %2174 = vmatpush1.bf16.msra.mxu0 %v2497_v21  ;;  %2203 = vmatpush3.bf16.msra.mxu1 %v2563_v43 }
 0x442   :  { %2176 = vmatprep.subr.bf16.mxu0 %v2503_v23  ;;  %2204 = vmatprep.subr.bf16.mxu1 %v2414_v3 }
 0x445   :  { %2178 = vmatpush1.bf16.msra.mxu0 %v2529_v32  ;;  %2206 = vmatpush3.bf16.msra.mxu1 %v2591_v52 }
 0x446   :  { %2180 = vmatprep.subr.bf16.mxu0 %v2538_v35  ;;  %2207 = vmatprep.subr.bf16.mxu1 %v2414_v3 }
 0x449   :  { %2182 = vmatpush1.bf16.msra.mxu0 %v2557_v41  ;;  %2209 = vmatpush3.bf16.msra.mxu1 %v2619_v61 }
 0x44a   :  { %2184 = vmatprep.subr.bf16.mxu0 %v2566_v44  ;;  %2210 = vmatprep.subr.bf16.mxu1 %v2414_v3 }
 0x44d   :  { %2186 = vmatpush1.bf16.msra.mxu0 %v2585_v50  ;;  %2212 = vmatpush3.bf16.msra.mxu1 %v2638_v6 }
 0x44e   :  { %2188 = vmatprep.subr.bf16.mxu0 %v2594_v53  ;;  %2213 = vmatprep.subr.bf16.mxu1 %v2414_v3 }
 0x451   :  { %2190 = vmatpush1.bf16.msra.mxu0 %v2613_v59  ;;  %2215 = vmatpush3.bf16.msra.mxu1 %v2650_v11 }
 0x452   :  { %2192 = vmatprep.subr.bf16.mxu0 %v2622_v62  ;;  %2216 = vmatprep.subr.bf16.mxu1 %v2414_v3 }
 0x455   :  { %2194 = vmatpush1.bf16.msra.mxu0 %v2635_v2  ;;  %2218 = vmatpush3.bf16.msra.mxu1 %v2662_v14 }
 0x456   :  { %2220 = vmatprep.subr.bf16.mxu0 %v2448_v5  ;;  %2251 = vmatprep.subr.bf16.mxu1 %v2414_v3 }
 0x50b   :  { %v815_v51 = vpop.f32.mrb[8].mxu0  ;;  %v886_v54 = vpop.f32.mrb[8].mxu1 }
 0x50c   :  { %v890_v55 = vadd.f32 %v1443_v49, %v815_v51  ;;  %v817_v56 = vpop.f32.mrb[9].mxu0  ;;  %v1777_v57 = vpop.f32.mrb[9].mxu1  ;;  %v904_v12 = vadd.f32 %v2712_v33, %v886_v54  ;;  %v1451_v51 = vld [vmem:[%s3057_s0 + $0x88] sm:$0xff] }
 0x50d   :  { %v891_v63 = vadd.f32 %v1444_v60, %v817_v56 }
 0x50e   :  { %v1446_v58 = vmul.f32 -1.442695, %v890_v55 }
 0x50f   :  { %v1447_v0 = vmul.f32 -1.442695, %v891_v63 }
 0x510   :  { %2374 = vpow2.f32 %v1446_v58 }
 0x511   :  { %2376 = vpow2.f32 %v1447_v0 }
 0x51a   :  { %v2375_v1 = vpop.eup %2374 }
 0x51b   :  { %v898_v7 = vadd.f32 1.0, %v2375_v1  ;;  %v2377_v8 = vpop.eup %2376 }
 0x51c   :  { %v899_v20 = vadd.f32 1.0, %v2377_v8 }
 0x51d   :  { %2378 = vrcp.f32 %v898_v7 }
 0x527   :  { %v2379_v13 = vpop.eup %2378 }
 0x528   :  { %v905_v18 = vmul.f32 %v2379_v13, %v904_v12 }
 0x52a   :  { %v906_v19 = vadd.f32 %v1445_v17, %v905_v18  ;;  %v1462_v18 = vld [vmem:[%s3057_s0 + $0xb0] sm:$0xff] }
 0x52c   :  { %2380 = vtanh.f32 %v906_v19 }
 0x52d   :  { %2382 = vrcp.f32 %v899_v20 }
 0x536   :  { %v2381_v22 = vpop.eup %2380 }
 0x537   :  { %v908_v24 = vsub.f32 %v2880_v48, %v2381_v22  ;;  %v2383_v25 = vpop.eup %2382 }
 0x539   :  { %v909_v26 = vmul.f32 %v2383_v25, %v908_v24 }
 0x53b   :  { %v2934_v27 = vadd.f32 %v2381_v22, %v909_v26 }
 0x53d   :  { %1448 = vst [vmem:[%s3059_s3 + $0x20] sm:$0xff] %v2934_v27  ;;  %982 = vmatmul.mubr.f32.vlgmr.msra.gmra.mrb[10].mxu0 %v2934_v27  ;;  %1811 = vmatmul.mubr.f32.vlgmr.msra.gmra.mrb[10].mxu1 %v2934_v27 }
 0x53e   :  { %2222 = vmatpush1.bf16.msra.mxu0 %v2461_v9  ;;  %2253 = vmatpush3.bf16.msra.mxu1 %v2520_v29 }
 0x53f   :  { %2224 = vmatprep.subr.bf16.mxu0 %v2463_v10  ;;  %2254 = vmatprep.subr.bf16.mxu1 %v2414_v3 }
 0x540   :  { %1149 = vmatprep.mubr.f32.mxu0 %v2415_v4  ;;  %1845 = vmatprep.mubr.msk.f32.mxu1 %vm2416_vm0, %v2415_v4 }
 0x542   :  { %2226 = vmatpush1.bf16.msra.mxu0 %v2479_v15  ;;  %2256 = vmatpush3.bf16.msra.mxu1 %v2535_v34 }
 0x543   :  { %2228 = vmatprep.subr.bf16.mxu0 %v2482_v16  ;;  %2257 = vmatprep.subr.bf16.mxu1 %v2414_v3 }
 0x546   :  { %2230 = vmatpush1.bf16.msra.mxu0 %v2497_v21  ;;  %2259 = vmatpush3.bf16.msra.mxu1 %v2563_v43 }
 0x547   :  { %2232 = vmatprep.subr.bf16.mxu0 %v2503_v23  ;;  %2260 = vmatprep.subr.bf16.mxu1 %v2414_v3 }
 0x54a   :  { %2234 = vmatpush1.bf16.msra.mxu0 %v2529_v32  ;;  %2262 = vmatpush3.bf16.msra.mxu1 %v2591_v52 }
 0x54b   :  { %2236 = vmatprep.subr.bf16.mxu0 %v2538_v35  ;;  %2263 = vmatprep.subr.bf16.mxu1 %v2414_v3 }
 0x54e   :  { %2238 = vmatpush1.bf16.msra.mxu0 %v2557_v41  ;;  %2265 = vmatpush3.bf16.msra.mxu1 %v2619_v61 }
 0x54f   :  { %2240 = vmatprep.subr.bf16.mxu0 %v2566_v44  ;;  %2266 = vmatprep.subr.bf16.mxu1 %v2414_v3 }
 0x552   :  { %2242 = vmatpush1.bf16.msra.mxu0 %v2585_v50  ;;  %2268 = vmatpush3.bf16.msra.mxu1 %v2638_v6 }
 0x553   :  { %2244 = vmatprep.subr.bf16.mxu0 %v2594_v53  ;;  %2269 = vmatprep.subr.bf16.mxu1 %v2414_v3 }
 0x556   :  { %2246 = vmatpush1.bf16.msra.mxu0 %v2613_v59  ;;  %2271 = vmatpush3.bf16.msra.mxu1 %v2650_v11 }
 0x557   :  { %2248 = vmatprep.subr.bf16.mxu0 %v2622_v62  ;;  %2272 = vmatprep.subr.bf16.mxu1 %v2414_v3 }
 0x55a   :  { %2250 = vmatpush1.bf16.msra.mxu0 %v2635_v2  ;;  %2274 = vmatpush3.bf16.msra.mxu1 %v2662_v14 }
 0x55b   :  { %2276 = vmatprep.subr.bf16.mxu0 %v2448_v5  ;;  %2307 = vmatprep.subr.bf16.mxu1 %v2414_v3 }
 0x610   :  { %v983_v30 = vpop.f32.mrb[10].mxu0  ;;  %v1054_v31 = vpop.f32.mrb[10].mxu1 }
 0x611   :  { %v1058_v36 = vadd.f32 %v1449_v28, %v983_v30  ;;  %v985_v37 = vpop.f32.mrb[11].mxu0  ;;  %v1812_v38 = vpop.f32.mrb[11].mxu1  ;;  %v1072_v48 = vadd.f32 %v2712_v33, %v1054_v31  ;;  %v1463_v28 = vld [vmem:[%s3057_s0 + $0xb8] sm:$0xff] }
 0x612   :  { %v1059_v42 = vadd.f32 %v1450_v40, %v985_v37 }
 0x613   :  { %v1452_v39 = vmul.f32 -1.442695, %v1058_v36 }
 0x614   :  { %v1453_v45 = vmul.f32 -1.442695, %v1059_v42 }
 0x615   :  { %2384 = vpow2.f32 %v1452_v39 }
 0x616   :  { %2386 = vpow2.f32 %v1453_v45 }
 0x61f   :  { %v2385_v5 = vpop.eup %2384 }
 0x620   :  { %v1066_v46 = vadd.f32 1.0, %v2385_v5  ;;  %v2387_v47 = vpop.eup %2386 }
 0x621   :  { %v1067_v56 = vadd.f32 1.0, %v2387_v47 }
 0x622   :  { %2388 = vrcp.f32 %v1066_v46 }
 0x62c   :  { %v2389_v49 = vpop.eup %2388 }
 0x62d   :  { %v1073_v54 = vmul.f32 %v2389_v49, %v1072_v48 }
 0x62f   :  { %v1074_v55 = vadd.f32 %v1451_v51, %v1073_v54 }
 0x631   :  { %2390 = vtanh.f32 %v1074_v55 }
 0x632   :  { %2392 = vrcp.f32 %v1067_v56 }
 0x63b   :  { %v2391_v57 = vpop.eup %2390 }
 0x63c   :  { %v1076_v58 = vsub.f32 %v2934_v27, %v2391_v57  ;;  %v2393_v60 = vpop.eup %2392 }
 0x63e   :  { %v1077_v63 = vmul.f32 %v2393_v60, %v1076_v58 }
 0x640   :  { %v2988_v0 = vadd.f32 %v2391_v57, %v1077_v63 }
 0x642   :  { %1454 = vst [vmem:[%s3059_s3 + $0x28] sm:$0xff] %v2988_v0  ;;  %1150 = vmatmul.mubr.f32.vlgmr.msra.gmra.mrb[12].mxu0 %v2988_v0  ;;  %1846 = vmatmul.mubr.f32.vlgmr.msra.gmra.mrb[12].mxu1 %v2988_v0 }
 0x643   :  { %2278 = vmatpush1.bf16.msra.mxu0 %v2461_v9  ;;  %2309 = vmatpush3.bf16.msra.mxu1 %v2520_v29  ;;  %v1456_v29 = vld [vmem:[%s3057_s0 + $0x98] sm:$0xff] }
 0x644   :  { %2280 = vmatprep.subr.bf16.mxu0 %v2463_v10  ;;  %2310 = vmatprep.subr.bf16.mxu1 %v2414_v3 }
 0x645   :  { %1317 = vmatprep.mubr.f32.mxu0 %v2415_v4  ;;  %1880 = vmatprep.mubr.msk.f32.mxu1 %vm2416_vm0, %v2415_v4  ;;  %v1455_v4 = vld [vmem:[%s3057_s0 + $0x90] sm:$0xff] }
 0x647   :  { %2282 = vmatpush1.bf16.msra.mxu0 %v2479_v15  ;;  %2312 = vmatpush3.bf16.msra.mxu1 %v2535_v34 }
 0x648   :  { %2284 = vmatprep.subr.bf16.mxu0 %v2482_v16  ;;  %2313 = vmatprep.subr.bf16.mxu1 %v2414_v3 }
 0x64b   :  { %2286 = vmatpush1.bf16.msra.mxu0 %v2497_v21  ;;  %2315 = vmatpush3.bf16.msra.mxu1 %v2563_v43 }
 0x64c   :  { %2288 = vmatprep.subr.bf16.mxu0 %v2503_v23  ;;  %2316 = vmatprep.subr.bf16.mxu1 %v2414_v3 }
 0x64f   :  { %2290 = vmatpush1.bf16.msra.mxu0 %v2529_v32  ;;  %2318 = vmatpush3.bf16.msra.mxu1 %v2591_v52 }
 0x650   :  { %2292 = vmatprep.subr.bf16.mxu0 %v2538_v35  ;;  %2319 = vmatprep.subr.bf16.mxu1 %v2414_v3 }
 0x653   :  { %2294 = vmatpush1.bf16.msra.mxu0 %v2557_v41  ;;  %2321 = vmatpush3.bf16.msra.mxu1 %v2619_v61 }
 0x654   :  { %2296 = vmatprep.subr.bf16.mxu0 %v2566_v44  ;;  %2322 = vmatprep.subr.bf16.mxu1 %v2414_v3 }
 0x657   :  { %2298 = vmatpush1.bf16.msra.mxu0 %v2585_v50  ;;  %2324 = vmatpush3.bf16.msra.mxu1 %v2638_v6  ;;  %v1457_v50 = vld [vmem:[%s3057_s0 + $0xa0] sm:$0xff] }
 0x658   :  { %2300 = vmatprep.subr.bf16.mxu0 %v2594_v53  ;;  %2325 = vmatprep.subr.bf16.mxu1 %v2414_v3 }
 0x65b   :  { %2302 = vmatpush1.bf16.msra.mxu0 %v2613_v59  ;;  %2327 = vmatpush3.bf16.msra.mxu1 %v2650_v11 }
 0x65c   :  { %2304 = vmatprep.subr.bf16.mxu0 %v2622_v62  ;;  %2328 = vmatprep.subr.bf16.mxu1 %v2414_v3 }
 0x65f   :  { %2306 = vmatpush1.bf16.msra.mxu0 %v2635_v2  ;;  %2330 = vmatpush3.bf16.msra.mxu1 %v2662_v14  ;;  %v1461_v14 = vld [vmem:[%s3057_s0 + $0xa8] sm:$0xff] }
 0x715   :  { %v1151_v9 = vpop.f32.mrb[12].mxu0  ;;  %v1222_v10 = vpop.f32.mrb[12].mxu1 }
 0x716   :  { %v1226_v15 = vadd.f32 %v1455_v4, %v1151_v9  ;;  %v1153_v16 = vpop.f32.mrb[13].mxu0  ;;  %v1847_v21 = vpop.f32.mrb[13].mxu1  ;;  %v1240_v43 = vadd.f32 %v2712_v33, %v1222_v10 }
 0x717   :  { %v1227_v3 = vadd.f32 %v1456_v29, %v1153_v16 }
 0x718   :  { %v1458_v23 = vmul.f32 -1.442695, %v1226_v15 }
 0x719   :  { %v1459_v32 = vmul.f32 -1.442695, %v1227_v3 }
 0x71a   :  { %2394 = vpow2.f32 %v1458_v23 }
 0x71b   :  { %2396 = vpow2.f32 %v1459_v32 }
 0x724   :  { %v2395_v34 = vpop.eup %2394 }
 0x725   :  { %v1234_v35 = vadd.f32 1.0, %v2395_v34  ;;  %v2397_v41 = vpop.eup %2396 }
 0x726   :  { %v1235_v59 = vadd.f32 1.0, %v2397_v41 }
 0x727   :  { %2398 = vrcp.f32 %v1234_v35 }
 0x731   :  { %v2399_v44 = vpop.eup %2398 }
 0x732   :  { %v1241_v52 = vmul.f32 %v2399_v44, %v1240_v43 }
 0x734   :  { %v1242_v53 = vadd.f32 %v1457_v50, %v1241_v52 }
 0x736   :  { %2400 = vtanh.f32 %v1242_v53 }
 0x737   :  { %2402 = vrcp.f32 %v1235_v59 }
 0x740   :  { %v2401_v61 = vpop.eup %2400 }
 0x741   :  { %v1244_v62 = vsub.f32 %v2988_v0, %v2401_v61  ;;  %v2403_v2 = vpop.eup %2402 }
 0x743   :  { %v1245_v6 = vmul.f32 %v2403_v2, %v1244_v62 }
 0x745   :  { %v1246_v11 = vadd.f32 %v2401_v61, %v1245_v6 }
 0x747   :  { %1460 = vst [vmem:[%s3059_s3 + $0x30] sm:$0xff] %v1246_v11  ;;  %1318 = vmatmul.mubr.f32.vlgmr.msra.gmra.mrb[14].mxu0 %v1246_v11  ;;  %1881 = vmatmul.mubr.f32.vlgmr.msra.gmra.mrb[14].mxu1 %v1246_v11 }
 0x81a   :  { %v1319_v1 = vpop.f32.mrb[14].mxu0  ;;  %v1390_v7 = vpop.f32.mrb[14].mxu1 }
 0x81b   :  { %v1394_v8 = vadd.f32 %v1461_v14, %v1319_v1  ;;  %v1321_v12 = vpop.f32.mrb[15].mxu0  ;;  %v1882_v13 = vpop.f32.mrb[15].mxu1  ;;  %v1408_v26 = vadd.f32 %v2712_v33, %v1390_v7 }
 0x81c   :  { %v1395_v19 = vadd.f32 %v1462_v18, %v1321_v12 }
 0x81d   :  { %v1464_v17 = vmul.f32 -1.442695, %v1394_v8 }
 0x81e   :  { %v1465_v20 = vmul.f32 -1.442695, %v1395_v19 }
 0x81f   :  { %2404 = vpow2.f32 %v1464_v17 }
 0x820   :  { %2406 = vpow2.f32 %v1465_v20 }
 0x829   :  { %v2405_v22 = vpop.eup %2404 }
 0x82a   :  { %v1402_v24 = vadd.f32 1.0, %v2405_v22  ;;  %v2407_v25 = vpop.eup %2406 }
 0x82b   :  { %v1403_v36 = vadd.f32 1.0, %v2407_v25 }
 0x82c   :  { %2408 = vrcp.f32 %v1402_v24 }
 0x836   :  { %v2409_v27 = vpop.eup %2408 }
 0x837   :  { %v1409_v30 = vmul.f32 %v2409_v27, %v1408_v26 }
 0x839   :  { %v1410_v31 = vadd.f32 %v1463_v28, %v1409_v30 }
 0x83b   :  { %2410 = vtanh.f32 %v1410_v31 }
 0x83c   :  { %2412 = vrcp.f32 %v1403_v36 }
 0x845   :  { %v2411_v37 = vpop.eup %2410 }
 0x846   :  { %v1412_v38 = vsub.f32 %v1246_v11, %v2411_v37  ;;  %v2413_v39 = vpop.eup %2412 }
 0x848   :  { %v1413_v40 = vmul.f32 %v2413_v39, %v1412_v38 }
 0x84a   :  { %v1414_v42 = vadd.f32 %v2411_v37, %v1413_v40 }
 0x84c   :  { %1466 = vst [vmem:[%s3059_s3 + $0x38] sm:$0xff] %v1414_v42 }

</bundles_post_ra>
